<compile_context>
chip_gen: v7x
topology: tpu7x:2x2x1
jax: 0.10.0
libtpu: 0.0.40
codegen_flags: <defaults>
</compile_context>

<pallas_src>
import functools

import numpy as np
import jax
import jax.numpy as jnp
from jax.experimental import pallas as pl
from jax.experimental.pallas import tpu as pltpu

_BN_EPS = 1e-5
_LRELU_SLOPE = 0.1


def _round_up(v, m):
    return ((v + m - 1) // m) * m


# ------------------------------ Pallas kernel --------------------------------

def _make_fused_layer_kernel(N, Hin, Win, Cin, Cout, KH, KW, pad, S):
    """One full layer: SNConv2d (as a Toeplitz matmul) + BatchNorm2d (batch
    stats computed in-kernel over the whole batch) + LeakyReLU(0.1).

    Refs (single grid step covering the whole batch):
      x_ref      : (N, Hin, Win*Cin)   input, channels fused into lanes, bf16
      b_ref      : (KH*S, Wout*Cout)   width-Toeplitz spectral-normed weight, bf16
      p_ref      : (WC, WC)            channel-averaging pattern P[i,j] = [i==j mod Cout], f32
      gamma_t_ref: (1, WC)             BN gamma tiled to the (w*Cout + c) lane layout, f32
      beta_t_ref : (1, WC)             BN beta tiled likewise, f32
      o_ref      : (N, Hout, WC)       activated output (bf16 between layers, f32 at the end)
      a_ref      : (N*Hout, KH*S)      bf16 VMEM scratch -- the matmul LHS slab
    """
    Hout = Hin + 2 * pad - KH + 1
    Wout = Win + 2 * pad - KW + 1
    WC = Wout * Cout
    WinC = Win * Cin
    inv_count = 1.0 / float(N * Hout * Wout)

    def kernel(x_ref, b_ref, p_ref, gamma_t_ref, beta_t_ref, o_ref, a_ref):
        # ---- assemble the matmul LHS A (bf16), lane-aligned dy blocks ----
        # Single zero fill per call (one grid step); provides the H halo rows
        # and the alignment filler columns.  Every data write starts at a
        # multiple of S (a multiple of 128 lanes).
        a_ref[...] = jnp.zeros_like(a_ref)
        for n in range(N):
            for dy in range(KH):
                h0 = max(0, pad - dy)
                h1 = min(Hout, Hin + pad - dy)
                if h1 <= h0:
                    continue
                r0 = h0 + dy - pad
                a_ref[n * Hout + h0:n * Hout + h1, dy * S:dy * S + WinC] = (
                    x_ref[n, r0:r0 + (h1 - h0), :].astype(jnp.bfloat16))

        # ---- one MXU matmul for the whole batch (M = N*Hout) ----
        y = jnp.dot(a_ref[...], b_ref[...],
                    preferred_element_type=jnp.float32)        # (N*Hout, WC) f32

        # ---- BatchNorm batch statistics, finished in-kernel (lane-dense) ----
        col_s = jnp.sum(y, axis=0, keepdims=True)              # (1, WC)
        col_ss = jnp.sum(y * y, axis=0, keepdims=True)         # (1, WC)
        # Sum lanes belonging to the same channel and broadcast back, all in
        # one small matmul with the constant pattern P (no reshapes/relayouts).
        sum_t = jnp.dot(col_s, p_ref[...], preferred_element_type=jnp.float32)
        ssum_t = jnp.dot(col_ss, p_ref[...], preferred_element_type=jnp.float32)
        mean_t = sum_t * inv_count
        var_t = jnp.maximum(ssum_t * inv_count - mean_t * mean_t, 0.0)
        scale_t = gamma_t_ref[...] / jnp.sqrt(var_t + _BN_EPS)
        shift_t = beta_t_ref[...] - mean_t * scale_t

        # ---- affine + LeakyReLU, then the single (lane-dense) store ----
        z = y * scale_t + shift_t
        z = jnp.where(z >= 0, z, jnp.float32(_LRELU_SLOPE) * z)
        for n in range(N):
            o_ref[n] = z[n * Hout:(n + 1) * Hout, :].astype(o_ref.dtype)

    return kernel


# ------------------------------ Pallas wrapper --------------------------------

def fused_snconv_bn_lrelu(x_fused, b_mat, p_mat, gamma_t, beta_t,
                          Hin, Win, Cin, Cout, KH, KW, pad, S, out_dtype):
    """One fused layer = SNConv2d + BatchNorm2d(batch stats) + LeakyReLU."""
    N = x_fused.shape[0]
    Hout = Hin + 2 * pad - KH + 1
    Wout = Win + 2 * pad - KW + 1
    WC = Wout * Cout

    kernel = _make_fused_layer_kernel(N, Hin, Win, Cin, Cout, KH, KW, pad, S)

    # Single grid step (whole batch in VMEM -> BN can finish in-kernel).
    # Constant operands (b/p/gamma/beta) are only fetched once, so the default
    # double-buffering is moot at grid size 1.
    return pl.pallas_call(
        kernel,
        out_shape=jax.ShapeDtypeStruct((N, Hout, WC), out_dtype),
        grid=(1,),
        in_specs=[
            pl.BlockSpec((N, Hin, Win * Cin), lambda i: (0, 0, 0)),
            pl.BlockSpec((KH * S, WC), lambda i: (0, 0)),
            pl.BlockSpec((WC, WC), lambda i: (0, 0)),
            pl.BlockSpec((1, WC), lambda i: (0, 0)),
            pl.BlockSpec((1, WC), lambda i: (0, 0)),
        ],
        out_specs=pl.BlockSpec((N, Hout, WC), lambda i: (0, 0, 0)),
        scratch_shapes=[pltpu.VMEM((N * Hout, KH * S), jnp.bfloat16)],
        compiler_params=pltpu.CompilerParams(
            dimension_semantics=("arbitrary",),
            vmem_limit_bytes=32 * 1024 * 1024),
    )(x_fused, b_mat, p_mat, gamma_t, beta_t)


# --------------------------------- JAX glue ----------------------------------

def spectral_norm_weight(w_oihw, u, n_power_iterations=1, eps=1e-12):
    """Spectral normalization of a conv weight (PyTorch-style, 1 power iter).
    Note: forward-only; the updated u vector is not persisted (PyTorch updates
    it in-place each forward during training)."""
    cout = w_oihw.shape[0]
    w_mat = w_oihw.reshape(cout, -1)
    v = None
    for _ in range(n_power_iterations):
        v = w_mat.T @ u
        v = v / (jnp.linalg.norm(v) + eps)
        u = w_mat @ v
        u = u / (jnp.linalg.norm(u) + eps)
    sigma = u @ (w_mat @ v)
    return w_oihw / sigma


def _toeplitz_weight(w_oihw, u, Win, pad, S):
    """Spectral-normalize, then expand to the lane-aligned width-Toeplitz RHS
        B[dy*S + win*Cin + ci, w*Cout + co] = W_sn[co, ci, dy, win + pad - w]
    (zero outside the taps; rows [Win*Cin, S) of each dy block are zero
    filler so dy blocks start on 128-lane boundaries).  bf16 for the MXU."""
    Cout, Cin, KH, KW = w_oihw.shape
    Wout = Win + 2 * pad - KW + 1
    w_sn = spectral_norm_weight(w_oihw, u)
    w_hwio = jnp.transpose(w_sn, (2, 3, 1, 0))                    # (KH, KW, Cin, Cout)
    dx = (jnp.arange(Win)[:, None] + pad) - jnp.arange(Wout)[None, :]  # (Win, Wout)
    mask = (dx >= 0) & (dx < KW)
    g = w_hwio[:, jnp.clip(dx, 0, KW - 1), :, :]                  # (KH, Win, Wout, Cin, Cout)
    g = g * mask[None, :, :, None, None]
    b = jnp.transpose(g, (0, 1, 3, 2, 4)).reshape(KH, Win * Cin, Wout * Cout)
    b = jnp.pad(b, ((0, 0), (0, S - Win * Cin), (0, 0)))
    return b.reshape(KH * S, Wout * Cout).astype(jnp.bfloat16)


def _channel_pattern(Wout, Cout):
    """P[i, j] = 1 iff lanes i and j hold the same channel (i == j mod Cout)."""
    idx = jnp.arange(Wout * Cout)
    return (idx[:, None] % Cout == idx[None, :] % Cout).astype(jnp.float32)


def _tile_channelwise(vec, width):
    """(C,) -> (1, width*C) matching the fused (w*C + c) lane layout."""
    return jnp.tile(vec.astype(jnp.float32), (width,)).reshape(1, -1)


@functools.partial(jax.jit, static_argnums=2)
def conv_block_forward(x_nchw, params, padding):
    """ConvBlock forward. Input/output are NCHW like the PyTorch module.
    The conv bias folds away exactly into the training-mode BatchNorm (batch
    statistics); this would NOT hold for eval-mode BN with running stats."""
    N, Cin, H, W = x_nchw.shape
    # NCHW -> channels-last, fuse (W, C) into the lane dimension, bf16 operands.
    x = jnp.transpose(x_nchw, (0, 2, 3, 1)).astype(jnp.bfloat16).reshape(N, H, W * Cin)

    Hc, Wc, Cc = H, W, Cin
    n_layers = len(params)
    for li, (w_oihw, _bias, gamma, beta, u) in enumerate(params):
        Cout, _, KH, KW = w_oihw.shape
        Hout = Hc + 2 * padding - KH + 1
        Wout = Wc + 2 * padding - KW + 1
        S = _round_up(Wc * Cc, 128)
        b_mat = _toeplitz_weight(w_oihw, u, Wc, padding, S)
        p_mat = _channel_pattern(Wout, Cout)
        gamma_t = _tile_channelwise(gamma, Wout)
        beta_t = _tile_channelwise(beta, Wout)
        out_dtype = jnp.bfloat16 if li + 1 < n_layers else jnp.float32
        x = fused_snconv_bn_lrelu(x, b_mat, p_mat, gamma_t, beta_t,
                                  Hc, Wc, Cc, Cout, KH, KW, padding, S, out_dtype)
        Hc, Wc, Cc = Hout, Wout, Cout

    out = x.reshape(N, Hc, Wc, Cc).transpose(0, 3, 1, 2)  # -> NCHW
    return out


# ------------------------------ pure-JAX reference ----------------------------

def conv_block_reference(x_nchw, params, padding, conv_dtype=jnp.float32):
    """Pure-JAX reference. conv_dtype=bfloat16 mirrors the kernel's MXU operand
    precision (f32 accumulation); conv_dtype=float32 is the exact module math
    (including the explicit conv bias that the kernels fold into BN)."""
    x = x_nchw.astype(jnp.float32)
    for (w_oihw, bias, gamma, beta, u) in params:
        w_sn = spectral_norm_weight(w_oihw, u)
        y = jax.lax.conv_general_dilated(
            x.astype(conv_dtype), w_sn.astype(conv_dtype),
            window_strides=(1, 1),
            padding=((padding, padding), (padding, padding)),
            dimension_numbers=('NCHW', 'OIHW', 'NCHW'),
            preferred_element_type=jnp.float32)
        y = y + bias[None, :, None, None]
        mean = jnp.mean(y, axis=(0, 2, 3), keepdims=True)
        var = jnp.var(y, axis=(0, 2, 3), keepdims=True)
        z = (y - mean) / jnp.sqrt(var + _BN_EPS)
        z = z * gamma[None, :, None, None] + beta[None, :, None, None]
        x = jnp.where(z >= 0, z, _LRELU_SLOPE * z)
    return x


# ----------------------------------- main -------------------------------------

def make_params(key, in_channel, out_channel, kernel_size):
    """Deterministic synthetic parameters for the two SNConv2d + BN layers."""
    params = []
    cin = in_channel
    for _ in range(2):
        key, kw, kb, kg, kbe, ku = jax.random.split(key, 6)
        fan_in = cin * kernel_size * kernel_size
        bound = 1.0 / np.sqrt(fan_in)
        w = jax.random.uniform(kw, (out_channel, cin, kernel_size, kernel_size),
                               jnp.float32, -bound, bound)
        b = jax.random.uniform(kb, (out_channel,), jnp.float32, -bound, bound)
        # BatchNorm affine params (non-default values to exercise the path).
        gamma = jax.random.uniform(kg, (out_channel,), jnp.float32, 0.8, 1.2)
        beta = jax.random.uniform(kbe, (out_channel,), jnp.float32, -0.2, 0.2)
        u = jax.random.normal(ku, (out_channel,), jnp.float32)
        u = u / (jnp.linalg.norm(u) + 1e-12)
        params.append((w, b, gamma, beta, u))
        cin = out_channel
    return params


if __name__ == "__main__":
    key = jax.random.PRNGKey(0)
    key, kx = jax.random.split(key)

    in_channel, out_channel, kernel_size, padding = 4, 8, 3, 1
    x = jax.random.normal(kx, (2, in_channel, 16, 16), jnp.float32)  # NCHW

    params = make_params(key, in_channel, out_channel, kernel_size)

    out = jax.block_until_ready(conv_block_forward(x, params, padding))
    assert out.shape == (2, out_channel, 16, 16)

    # Tight check against a reference using the same bf16 MXU operand precision
    # (f32 accumulation) as the kernels.
    ref_bf16 = jax.block_until_ready(
        conv_block_reference(x, params, padding, conv_dtype=jnp.bfloat16))
    assert np.allclose(np.asarray(out), np.asarray(ref_bf16), rtol=1e-2, atol=1e-2)

    # Looser check against the exact f32 module semantics (only deviation is the
    # bf16 rounding of the conv/matmul operands and the inter-layer activation).
    ref_f32 = jax.block_until_ready(
        conv_block_reference(x, params, padding, conv_dtype=jnp.float32))
    assert np.allclose(np.asarray(out), np.asarray(ref_f32), rtol=5e-2, atol=8e-2)

    print("KERNEL_OK")
</pallas_src>

<mosaic_0001>
module attributes {stable_mosaic.version = 11 : i64} {
  func.func @kernel(%arg0: i32, %arg1: memref<2x16x64xbf16, #tpu.memory_space<vmem>>, %arg2: memref<384x128xbf16, #tpu.memory_space<vmem>>, %arg3: memref<128x128xf32, #tpu.memory_space<vmem>>, %arg4: memref<1x128xf32, #tpu.memory_space<vmem>>, %arg5: memref<1x128xf32, #tpu.memory_space<vmem>>, %arg6: memref<2x16x128xbf16, #tpu.memory_space<vmem>>, %arg7: memref<32x384xbf16, #tpu.memory_space<vmem>>) attributes {dimension_semantics = [#tpu.dimension_semantics<arbitrary>], iteration_bounds = array<i64: 1>, scalar_prefetch = 0 : i64, scratch_operands = 1 : i64, tpu.core_type = #tpu.core_type<tc>, window_params = [{pipeline_mode = #tpu.pipeline_mode<synchronous>, transform_indices = @transform_0, window_bounds = array<i64: 2, 16, 64>}, {pipeline_mode = #tpu.pipeline_mode<synchronous>, transform_indices = @transform_1, window_bounds = array<i64: 384, 128>}, {pipeline_mode = #tpu.pipeline_mode<synchronous>, transform_indices = @transform_2, window_bounds = array<i64: 128, 128>}, {pipeline_mode = #tpu.pipeline_mode<synchronous>, transform_indices = @transform_3, window_bounds = array<i64: 1, 128>}, {pipeline_mode = #tpu.pipeline_mode<synchronous>, transform_indices = @transform_4, window_bounds = array<i64: 1, 128>}, {pipeline_mode = #tpu.pipeline_mode<synchronous>, transform_indices = @transform_5, window_bounds = array<i64: 2, 16, 128>}]} {
    %cst = arith.constant 0.000000e+00 : bf16
    %0 = vector.broadcast %cst : bf16 to vector<32x384xbf16>
    %c0 = arith.constant 0 : index
    %c0_0 = arith.constant 0 : index
    %1 = vector.load %arg7[%c0, %c0_0] : memref<32x384xbf16, #tpu.memory_space<vmem>>, vector<32x384xbf16>
    tpu.vector_store %arg7[%c0, %c0_0], %0 {strides = array<i32>} : memref<32x384xbf16, #tpu.memory_space<vmem>>, vector<32x384xbf16>,
    %c0_1 = arith.constant 0 : index
    %c0_2 = arith.constant 0 : index
    %c0_3 = arith.constant 0 : index
    %2 = vector.load %arg1[%c0_1, %c0_2, %c0_3] : memref<2x16x64xbf16, #tpu.memory_space<vmem>>, vector<1x15x64xbf16>
    %3 = vector.shape_cast %2 : vector<1x15x64xbf16> to vector<15x64xbf16>
    %c1 = arith.constant 1 : index
    %c0_4 = arith.constant 0 : index
    %4 = vector.load %arg7[%c1, %c0_4] : memref<32x384xbf16, #tpu.memory_space<vmem>>, vector<15x64xbf16>
    tpu.vector_store %arg7[%c1, %c0_4], %3 {strides = array<i32>} : memref<32x384xbf16, #tpu.memory_space<vmem>>, vector<15x64xbf16>,
    %c0_5 = arith.constant 0 : index
    %c0_6 = arith.constant 0 : index
    %c0_7 = arith.constant 0 : index
    %5 = vector.load %arg1[%c0_5, %c0_6, %c0_7] : memref<2x16x64xbf16, #tpu.memory_space<vmem>>, vector<1x16x64xbf16>
    %6 = vector.shape_cast %5 : vector<1x16x64xbf16> to vector<16x64xbf16>
    %c0_8 = arith.constant 0 : index
    %c128 = arith.constant 128 : index
    %7 = vector.load %arg7[%c0_8, %c128] : memref<32x384xbf16, #tpu.memory_space<vmem>>, vector<16x64xbf16>
    tpu.vector_store %arg7[%c0_8, %c128], %6 {strides = array<i32>} : memref<32x384xbf16, #tpu.memory_space<vmem>>, vector<16x64xbf16>,
    %c0_9 = arith.constant 0 : index
    %c1_10 = arith.constant 1 : index
    %c0_11 = arith.constant 0 : index
    %8 = vector.load %arg1[%c0_9, %c1_10, %c0_11] : memref<2x16x64xbf16, #tpu.memory_space<vmem>>, vector<1x15x64xbf16>
    %9 = vector.shape_cast %8 : vector<1x15x64xbf16> to vector<15x64xbf16>
    %c0_12 = arith.constant 0 : index
    %c256 = arith.constant 256 : index
    %10 = vector.load %arg7[%c0_12, %c256] : memref<32x384xbf16, #tpu.memory_space<vmem>>, vector<15x64xbf16>
    tpu.vector_store %arg7[%c0_12, %c256], %9 {strides = array<i32>} : memref<32x384xbf16, #tpu.memory_space<vmem>>, vector<15x64xbf16>,
    %c1_13 = arith.constant 1 : index
    %c0_14 = arith.constant 0 : index
    %c0_15 = arith.constant 0 : index
    %11 = vector.load %arg1[%c1_13, %c0_14, %c0_15] : memref<2x16x64xbf16, #tpu.memory_space<vmem>>, vector<1x15x64xbf16>
    %12 = vector.shape_cast %11 : vector<1x15x64xbf16> to vector<15x64xbf16>
    %c17 = arith.constant 17 : index
    %c0_16 = arith.constant 0 : index
    %13 = vector.load %arg7[%c17, %c0_16] : memref<32x384xbf16, #tpu.memory_space<vmem>>, vector<15x64xbf16>
    tpu.vector_store %arg7[%c17, %c0_16], %12 {strides = array<i32>} : memref<32x384xbf16, #tpu.memory_space<vmem>>, vector<15x64xbf16>,
    %c1_17 = arith.constant 1 : index
    %c0_18 = arith.constant 0 : index
    %c0_19 = arith.constant 0 : index
    %14 = vector.load %arg1[%c1_17, %c0_18, %c0_19] : memref<2x16x64xbf16, #tpu.memory_space<vmem>>, vector<1x16x64xbf16>
    %15 = vector.shape_cast %14 : vector<1x16x64xbf16> to vector<16x64xbf16>
    %c16 = arith.constant 16 : index
    %c128_20 = arith.constant 128 : index
    %16 = vector.load %arg7[%c16, %c128_20] : memref<32x384xbf16, #tpu.memory_space<vmem>>, vector<16x64xbf16>
    tpu.vector_store %arg7[%c16, %c128_20], %15 {strides = array<i32>} : memref<32x384xbf16, #tpu.memory_space<vmem>>, vector<16x64xbf16>,
    %c1_21 = arith.constant 1 : index
    %c1_22 = arith.constant 1 : index
    %c0_23 = arith.constant 0 : index
    %17 = vector.load %arg1[%c1_21, %c1_22, %c0_23] : memref<2x16x64xbf16, #tpu.memory_space<vmem>>, vector<1x15x64xbf16>
    %18 = vector.shape_cast %17 : vector<1x15x64xbf16> to vector<15x64xbf16>
    %c16_24 = arith.constant 16 : index
    %c256_25 = arith.constant 256 : index
    %19 = vector.load %arg7[%c16_24, %c256_25] : memref<32x384xbf16, #tpu.memory_space<vmem>>, vector<15x64xbf16>
    tpu.vector_store %arg7[%c16_24, %c256_25], %18 {strides = array<i32>} : memref<32x384xbf16, #tpu.memory_space<vmem>>, vector<15x64xbf16>,
    %c0_26 = arith.constant 0 : index
    %c0_27 = arith.constant 0 : index
    %20 = vector.load %arg7[%c0_26, %c0_27] : memref<32x384xbf16, #tpu.memory_space<vmem>>, vector<32x384xbf16>
    %c0_28 = arith.constant 0 : index
    %c0_29 = arith.constant 0 : index
    %21 = vector.load %arg2[%c0_28, %c0_29] : memref<384x128xbf16, #tpu.memory_space<vmem>>, vector<384x128xbf16>
    %cst_30 = arith.constant dense<0.000000e+00> : vector<32x128xf32>
    %22 = tpu.matmul %20, %21, %cst_30 {dimension_numbers = #tpu.dot_dimension_numbers<[1], [0], [0], [1], [0, 0, 1, 1], [], []>} : vector<32x384xbf16>, vector<384x128xbf16>, vector<32x128xf32> -> vector<32x128xf32>
    %cst_31 = arith.constant dense<0.000000e+00> : vector<128xf32>
    %23 = vector.multi_reduction <add>, %22, %cst_31 [0] : vector<32x128xf32> to vector<128xf32>
    %24 = vector.shape_cast %23 : vector<128xf32> to vector<1x128xf32>
    %25 = arith.mulf %22, %22 : vector<32x128xf32>
    %cst_32 = arith.constant dense<0.000000e+00> : vector<128xf32>
    %26 = vector.multi_reduction <add>, %25, %cst_32 [0] : vector<32x128xf32> to vector<128xf32>
    %27 = vector.shape_cast %26 : vector<128xf32> to vector<1x128xf32>
    %c0_33 = arith.constant 0 : index
    %c0_34 = arith.constant 0 : index
    %28 = vector.load %arg3[%c0_33, %c0_34] : memref<128x128xf32, #tpu.memory_space<vmem>>, vector<128x128xf32>
    %cst_35 = arith.constant dense<0.000000e+00> : vector<1x128xf32>
    %29 = tpu.matmul %24, %28, %cst_35 {dimension_numbers = #tpu.dot_dimension_numbers<[1], [0], [0], [1], [0, 0, 1, 1], [], []>} : vector<1x128xf32>, vector<128x128xf32>, vector<1x128xf32> -> vector<1x128xf32>
    %c0_36 = arith.constant 0 : index
    %c0_37 = arith.constant 0 : index
    %30 = vector.load %arg3[%c0_36, %c0_37] : memref<128x128xf32, #tpu.memory_space<vmem>>, vector<128x128xf32>
    %cst_38 = arith.constant dense<0.000000e+00> : vector<1x128xf32>
    %31 = tpu.matmul %27, %30, %cst_38 {dimension_numbers = #tpu.dot_dimension_numbers<[1], [0], [0], [1], [0, 0, 1, 1], [], []>} : vector<1x128xf32>, vector<128x128xf32>, vector<1x128xf32> -> vector<1x128xf32>
    %cst_39 = arith.constant 0.001953125 : f32
    %32 = vector.broadcast %cst_39 : f32 to vector<1x128xf32>
    %33 = arith.mulf %29, %32 : vector<1x128xf32>
    %cst_40 = arith.constant 0.001953125 : f32
    %34 = vector.broadcast %cst_40 : f32 to vector<1x128xf32>
    %35 = arith.mulf %31, %34 : vector<1x128xf32>
    %36 = arith.mulf %33, %33 : vector<1x128xf32>
    %37 = arith.subf %35, %36 : vector<1x128xf32>
    %cst_41 = arith.constant 0.000000e+00 : f32
    %38 = vector.broadcast %cst_41 : f32 to vector<1x128xf32>
    %39 = arith.maximumf %37, %38 : vector<1x128xf32>
    %c0_42 = arith.constant 0 : index
    %c0_43 = arith.constant 0 : index
    %40 = vector.load %arg4[%c0_42, %c0_43] : memref<1x128xf32, #tpu.memory_space<vmem>>, vector<1x128xf32>
    %cst_44 = arith.constant 9.99999974E-6 : f32
    %41 = vector.broadcast %cst_44 : f32 to vector<1x128xf32>
    %42 = arith.addf %39, %41 : vector<1x128xf32>
    %43 = math.sqrt %42 : vector<1x128xf32>
    %44 = arith.divf %40, %43 : vector<1x128xf32>
    %c0_45 = arith.constant 0 : index
    %c0_46 = arith.constant 0 : index
    %45 = vector.load %arg5[%c0_45, %c0_46] : memref<1x128xf32, #tpu.memory_space<vmem>>, vector<1x128xf32>
    %46 = arith.mulf %33, %44 : vector<1x128xf32>
    %47 = arith.subf %45, %46 : vector<1x128xf32>
    %48 = vector.broadcast %44 : vector<1x128xf32> to vector<32x128xf32>
    %49 = arith.mulf %22, %48 : vector<32x128xf32>
    %50 = vector.broadcast %47 : vector<1x128xf32> to vector<32x128xf32>
    %51 = arith.addf %49, %50 : vector<32x128xf32>
    %cst_47 = arith.constant 0.000000e+00 : f32
    %52 = vector.broadcast %cst_47 : f32 to vector<32x128xf32>
    %53 = arith.cmpf oge, %51, %52 : vector<32x128xf32>
    %cst_48 = arith.constant 1.000000e-01 : f32
    %54 = vector.broadcast %cst_48 : f32 to vector<32x128xf32>
    %55 = arith.mulf %54, %51 : vector<32x128xf32>
    %56 = arith.select %53, %51, %55 : vector<32x128xi1>, vector<32x128xf32>
    %57 = vector.extract_strided_slice %56 {offsets = [0, 0], sizes = [16, 128], strides = [1, 1]} : vector<32x128xf32> to vector<16x128xf32>
    %58 = arith.truncf %57 : vector<16x128xf32> to vector<16x128xbf16>
    %c0_49 = arith.constant 0 : index
    %c0_50 = arith.constant 0 : index
    %c0_51 = arith.constant 0 : index
    %59 = vector.load %arg6[%c0_49, %c0_50, %c0_51] : memref<2x16x128xbf16, #tpu.memory_space<vmem>>, vector<1x16x128xbf16>
    %60 = vector.shape_cast %59 : vector<1x16x128xbf16> to vector<16x128xbf16>
    %61 = vector.shape_cast %58 : vector<16x128xbf16> to vector<1x16x128xbf16>
    tpu.vector_store %arg6[%c0_49, %c0_50, %c0_51], %61 {strides = array<i32>} : memref<2x16x128xbf16, #tpu.memory_space<vmem>>, vector<1x16x128xbf16>,
    %62 = vector.extract_strided_slice %56 {offsets = [16, 0], sizes = [16, 128], strides = [1, 1]} : vector<32x128xf32> to vector<16x128xf32>
    %63 = arith.truncf %62 : vector<16x128xf32> to vector<16x128xbf16>
    %c1_52 = arith.constant 1 : index
    %c0_53 = arith.constant 0 : index
    %c0_54 = arith.constant 0 : index
    %64 = vector.load %arg6[%c1_52, %c0_53, %c0_54] : memref<2x16x128xbf16, #tpu.memory_space<vmem>>, vector<1x16x128xbf16>
    %65 = vector.shape_cast %64 : vector<1x16x128xbf16> to vector<16x128xbf16>
    %66 = vector.shape_cast %63 : vector<16x128xbf16> to vector<1x16x128xbf16>
    tpu.vector_store %arg6[%c1_52, %c0_53, %c0_54], %66 {strides = array<i32>} : memref<2x16x128xbf16, #tpu.memory_space<vmem>>, vector<1x16x128xbf16>,
    return
  }
  func.func @transform_0(%arg0: i32) -> (i32, i32, i32) {
    %c0_i32 = arith.constant 0 : i32
    %c0_i32_0 = arith.constant 0 : i32
    %c0_i32_1 = arith.constant 0 : i32
    %c0_i32_2 = arith.constant 0 : i32
    return %c0_i32, %c0_i32_0, %c0_i32_1 : i32, i32, i32
  }
  func.func @transform_1(%arg0: i32) -> (i32, i32) {
    %c0_i32 = arith.constant 0 : i32
    %c0_i32_0 = arith.constant 0 : i32
    %c0_i32_1 = arith.constant 0 : i32
    return %c0_i32, %c0_i32_0 : i32, i32
  }
  func.func @transform_2(%arg0: i32) -> (i32, i32) {
    %c0_i32 = arith.constant 0 : i32
    %c0_i32_0 = arith.constant 0 : i32
    %c0_i32_1 = arith.constant 0 : i32
    return %c0_i32, %c0_i32_0 : i32, i32
  }
  func.func @transform_3(%arg0: i32) -> (i32, i32) {
    %c0_i32 = arith.constant 0 : i32
    %c0_i32_0 = arith.constant 0 : i32
    %c0_i32_1 = arith.constant 0 : i32
    return %c0_i32, %c0_i32_0 : i32, i32
  }
  func.func @transform_4(%arg0: i32) -> (i32, i32) {
    %c0_i32 = arith.constant 0 : i32
    %c0_i32_0 = arith.constant 0 : i32
    %c0_i32_1 = arith.constant 0 : i32
    return %c0_i32, %c0_i32_0 : i32, i32
  }
  func.func @transform_5(%arg0: i32) -> (i32, i32, i32) {
    %c0_i32 = arith.constant 0 : i32
    %c0_i32_0 = arith.constant 0 : i32
    %c0_i32_1 = arith.constant 0 : i32
    %c0_i32_2 = arith.constant 0 : i32
    return %c0_i32, %c0_i32_0, %c0_i32_1 : i32, i32, i32
  }
}

module attributes {stable_mosaic.version = 11 : i64} {
  func.func @kernel(%arg0: i32, %arg1: memref<2x16x128xbf16, #tpu.memory_space<vmem>>, %arg2: memref<384x128xbf16, #tpu.memory_space<vmem>>, %arg3: memref<128x128xf32, #tpu.memory_space<vmem>>, %arg4: memref<1x128xf32, #tpu.memory_space<vmem>>, %arg5: memref<1x128xf32, #tpu.memory_space<vmem>>, %arg6: memref<2x16x128xf32, #tpu.memory_space<vmem>>, %arg7: memref<32x384xbf16, #tpu.memory_space<vmem>>) attributes {dimension_semantics = [#tpu.dimension_semantics<arbitrary>], iteration_bounds = array<i64: 1>, scalar_prefetch = 0 : i64, scratch_operands = 1 : i64, tpu.core_type = #tpu.core_type<tc>, window_params = [{pipeline_mode = #tpu.pipeline_mode<synchronous>, transform_indices = @transform_0, window_bounds = array<i64: 2, 16, 128>}, {pipeline_mode = #tpu.pipeline_mode<synchronous>, transform_indices = @transform_1, window_bounds = array<i64: 384, 128>}, {pipeline_mode = #tpu.pipeline_mode<synchronous>, transform_indices = @transform_2, window_bounds = array<i64: 128, 128>}, {pipeline_mode = #tpu.pipeline_mode<synchronous>, transform_indices = @transform_3, window_bounds = array<i64: 1, 128>}, {pipeline_mode = #tpu.pipeline_mode<synchronous>, transform_indices = @transform_4, window_bounds = array<i64: 1, 128>}, {pipeline_mode = #tpu.pipeline_mode<synchronous>, transform_indices = @transform_5, window_bounds = array<i64: 2, 16, 128>}]} {
    %cst = arith.constant 0.000000e+00 : bf16
    %0 = vector.broadcast %cst : bf16 to vector<32x384xbf16>
    %c0 = arith.constant 0 : index
    %c0_0 = arith.constant 0 : index
    %1 = vector.load %arg7[%c0, %c0_0] : memref<32x384xbf16, #tpu.memory_space<vmem>>, vector<32x384xbf16>
    tpu.vector_store %arg7[%c0, %c0_0], %0 {strides = array<i32>} : memref<32x384xbf16, #tpu.memory_space<vmem>>, vector<32x384xbf16>,
    %c0_1 = arith.constant 0 : index
    %c0_2 = arith.constant 0 : index
    %c0_3 = arith.constant 0 : index
    %2 = vector.load %arg1[%c0_1, %c0_2, %c0_3] : memref<2x16x128xbf16, #tpu.memory_space<vmem>>, vector<1x15x128xbf16>
    %3 = vector.shape_cast %2 : vector<1x15x128xbf16> to vector<15x128xbf16>
    %c1 = arith.constant 1 : index
    %c0_4 = arith.constant 0 : index
    %4 = vector.load %arg7[%c1, %c0_4] : memref<32x384xbf16, #tpu.memory_space<vmem>>, vector<15x128xbf16>
    tpu.vector_store %arg7[%c1, %c0_4], %3 {strides = array<i32>} : memref<32x384xbf16, #tpu.memory_space<vmem>>, vector<15x128xbf16>,
    %c0_5 = arith.constant 0 : index
    %c0_6 = arith.constant 0 : index
    %c0_7 = arith.constant 0 : index
    %5 = vector.load %arg1[%c0_5, %c0_6, %c0_7] : memref<2x16x128xbf16, #tpu.memory_space<vmem>>, vector<1x16x128xbf16>
    %6 = vector.shape_cast %5 : vector<1x16x128xbf16> to vector<16x128xbf16>
    %c0_8 = arith.constant 0 : index
    %c128 = arith.constant 128 : index
    %7 = vector.load %arg7[%c0_8, %c128] : memref<32x384xbf16, #tpu.memory_space<vmem>>, vector<16x128xbf16>
    tpu.vector_store %arg7[%c0_8, %c128], %6 {strides = array<i32>} : memref<32x384xbf16, #tpu.memory_space<vmem>>, vector<16x128xbf16>,
    %c0_9 = arith.constant 0 : index
    %c1_10 = arith.constant 1 : index
    %c0_11 = arith.constant 0 : index
    %8 = vector.load %arg1[%c0_9, %c1_10, %c0_11] : memref<2x16x128xbf16, #tpu.memory_space<vmem>>, vector<1x15x128xbf16>
    %9 = vector.shape_cast %8 : vector<1x15x128xbf16> to vector<15x128xbf16>
    %c0_12 = arith.constant 0 : index
    %c256 = arith.constant 256 : index
    %10 = vector.load %arg7[%c0_12, %c256] : memref<32x384xbf16, #tpu.memory_space<vmem>>, vector<15x128xbf16>
    tpu.vector_store %arg7[%c0_12, %c256], %9 {strides = array<i32>} : memref<32x384xbf16, #tpu.memory_space<vmem>>, vector<15x128xbf16>,
    %c1_13 = arith.constant 1 : index
    %c0_14 = arith.constant 0 : index
    %c0_15 = arith.constant 0 : index
    %11 = vector.load %arg1[%c1_13, %c0_14, %c0_15] : memref<2x16x128xbf16, #tpu.memory_space<vmem>>, vector<1x15x128xbf16>
    %12 = vector.shape_cast %11 : vector<1x15x128xbf16> to vector<15x128xbf16>
    %c17 = arith.constant 17 : index
    %c0_16 = arith.constant 0 : index
    %13 = vector.load %arg7[%c17, %c0_16] : memref<32x384xbf16, #tpu.memory_space<vmem>>, vector<15x128xbf16>
    tpu.vector_store %arg7[%c17, %c0_16], %12 {strides = array<i32>} : memref<32x384xbf16, #tpu.memory_space<vmem>>, vector<15x128xbf16>,
    %c1_17 = arith.constant 1 : index
    %c0_18 = arith.constant 0 : index
    %c0_19 = arith.constant 0 : index
    %14 = vector.load %arg1[%c1_17, %c0_18, %c0_19] : memref<2x16x128xbf16, #tpu.memory_space<vmem>>, vector<1x16x128xbf16>
    %15 = vector.shape_cast %14 : vector<1x16x128xbf16> to vector<16x128xbf16>
    %c16 = arith.constant 16 : index
    %c128_20 = arith.constant 128 : index
    %16 = vector.load %arg7[%c16, %c128_20] : memref<32x384xbf16, #tpu.memory_space<vmem>>, vector<16x128xbf16>
    tpu.vector_store %arg7[%c16, %c128_20], %15 {strides = array<i32>} : memref<32x384xbf16, #tpu.memory_space<vmem>>, vector<16x128xbf16>,
    %c1_21 = arith.constant 1 : index
    %c1_22 = arith.constant 1 : index
    %c0_23 = arith.constant 0 : index
    %17 = vector.load %arg1[%c1_21, %c1_22, %c0_23] : memref<2x16x128xbf16, #tpu.memory_space<vmem>>, vector<1x15x128xbf16>
    %18 = vector.shape_cast %17 : vector<1x15x128xbf16> to vector<15x128xbf16>
    %c16_24 = arith.constant 16 : index
    %c256_25 = arith.constant 256 : index
    %19 = vector.load %arg7[%c16_24, %c256_25] : memref<32x384xbf16, #tpu.memory_space<vmem>>, vector<15x128xbf16>
    tpu.vector_store %arg7[%c16_24, %c256_25], %18 {strides = array<i32>} : memref<32x384xbf16, #tpu.memory_space<vmem>>, vector<15x128xbf16>,
    %c0_26 = arith.constant 0 : index
    %c0_27 = arith.constant 0 : index
    %20 = vector.load %arg7[%c0_26, %c0_27] : memref<32x384xbf16, #tpu.memory_space<vmem>>, vector<32x384xbf16>
    %c0_28 = arith.constant 0 : index
    %c0_29 = arith.constant 0 : index
    %21 = vector.load %arg2[%c0_28, %c0_29] : memref<384x128xbf16, #tpu.memory_space<vmem>>, vector<384x128xbf16>
    %cst_30 = arith.constant dense<0.000000e+00> : vector<32x128xf32>
    %22 = tpu.matmul %20, %21, %cst_30 {dimension_numbers = #tpu.dot_dimension_numbers<[1], [0], [0], [1], [0, 0, 1, 1], [], []>} : vector<32x384xbf16>, vector<384x128xbf16>, vector<32x128xf32> -> vector<32x128xf32>
    %cst_31 = arith.constant dense<0.000000e+00> : vector<128xf32>
    %23 = vector.multi_reduction <add>, %22, %cst_31 [0] : vector<32x128xf32> to vector<128xf32>
    %24 = vector.shape_cast %23 : vector<128xf32> to vector<1x128xf32>
    %25 = arith.mulf %22, %22 : vector<32x128xf32>
    %cst_32 = arith.constant dense<0.000000e+00> : vector<128xf32>
    %26 = vector.multi_reduction <add>, %25, %cst_32 [0] : vector<32x128xf32> to vector<128xf32>
    %27 = vector.shape_cast %26 : vector<128xf32> to vector<1x128xf32>
    %c0_33 = arith.constant 0 : index
    %c0_34 = arith.constant 0 : index
    %28 = vector.load %arg3[%c0_33, %c0_34] : memref<128x128xf32, #tpu.memory_space<vmem>>, vector<128x128xf32>
    %cst_35 = arith.constant dense<0.000000e+00> : vector<1x128xf32>
    %29 = tpu.matmul %24, %28, %cst_35 {dimension_numbers = #tpu.dot_dimension_numbers<[1], [0], [0], [1], [0, 0, 1, 1], [], []>} : vector<1x128xf32>, vector<128x128xf32>, vector<1x128xf32> -> vector<1x128xf32>
    %c0_36 = arith.constant 0 : index
    %c0_37 = arith.constant 0 : index
    %30 = vector.load %arg3[%c0_36, %c0_37] : memref<128x128xf32, #tpu.memory_space<vmem>>, vector<128x128xf32>
    %cst_38 = arith.constant dense<0.000000e+00> : vector<1x128xf32>
    %31 = tpu.matmul %27, %30, %cst_38 {dimension_numbers = #tpu.dot_dimension_numbers<[1], [0], [0], [1], [0, 0, 1, 1], [], []>} : vector<1x128xf32>, vector<128x128xf32>, vector<1x128xf32> -> vector<1x128xf32>
    %cst_39 = arith.constant 0.001953125 : f32
    %32 = vector.broadcast %cst_39 : f32 to vector<1x128xf32>
    %33 = arith.mulf %29, %32 : vector<1x128xf32>
    %cst_40 = arith.constant 0.001953125 : f32
    %34 = vector.broadcast %cst_40 : f32 to vector<1x128xf32>
    %35 = arith.mulf %31, %34 : vector<1x128xf32>
    %36 = arith.mulf %33, %33 : vector<1x128xf32>
    %37 = arith.subf %35, %36 : vector<1x128xf32>
    %cst_41 = arith.constant 0.000000e+00 : f32
    %38 = vector.broadcast %cst_41 : f32 to vector<1x128xf32>
    %39 = arith.maximumf %37, %38 : vector<1x128xf32>
    %c0_42 = arith.constant 0 : index
    %c0_43 = arith.constant 0 : index
    %40 = vector.load %arg4[%c0_42, %c0_43] : memref<1x128xf32, #tpu.memory_space<vmem>>, vector<1x128xf32>
    %cst_44 = arith.constant 9.99999974E-6 : f32
    %41 = vector.broadcast %cst_44 : f32 to vector<1x128xf32>
    %42 = arith.addf %39, %41 : vector<1x128xf32>
    %43 = math.sqrt %42 : vector<1x128xf32>
    %44 = arith.divf %40, %43 : vector<1x128xf32>
    %c0_45 = arith.constant 0 : index
    %c0_46 = arith.constant 0 : index
    %45 = vector.load %arg5[%c0_45, %c0_46] : memref<1x128xf32, #tpu.memory_space<vmem>>, vector<1x128xf32>
    %46 = arith.mulf %33, %44 : vector<1x128xf32>
    %47 = arith.subf %45, %46 : vector<1x128xf32>
    %48 = vector.broadcast %44 : vector<1x128xf32> to vector<32x128xf32>
    %49 = arith.mulf %22, %48 : vector<32x128xf32>
    %50 = vector.broadcast %47 : vector<1x128xf32> to vector<32x128xf32>
    %51 = arith.addf %49, %50 : vector<32x128xf32>
    %cst_47 = arith.constant 0.000000e+00 : f32
    %52 = vector.broadcast %cst_47 : f32 to vector<32x128xf32>
    %53 = arith.cmpf oge, %51, %52 : vector<32x128xf32>
    %cst_48 = arith.constant 1.000000e-01 : f32
    %54 = vector.broadcast %cst_48 : f32 to vector<32x128xf32>
    %55 = arith.mulf %54, %51 : vector<32x128xf32>
    %56 = arith.select %53, %51, %55 : vector<32x128xi1>, vector<32x128xf32>
    %57 = vector.extract_strided_slice %56 {offsets = [0, 0], sizes = [16, 128], strides = [1, 1]} : vector<32x128xf32> to vector<16x128xf32>
    %c0_49 = arith.constant 0 : index
    %c0_50 = arith.constant 0 : index
    %c0_51 = arith.constant 0 : index
    %58 = vector.load %arg6[%c0_49, %c0_50, %c0_51] : memref<2x16x128xf32, #tpu.memory_space<vmem>>, vector<1x16x128xf32>
    %59 = vector.shape_cast %58 : vector<1x16x128xf32> to vector<16x128xf32>
    %60 = vector.shape_cast %57 : vector<16x128xf32> to vector<1x16x128xf32>
    tpu.vector_store %arg6[%c0_49, %c0_50, %c0_51], %60 {strides = array<i32>} : memref<2x16x128xf32, #tpu.memory_space<vmem>>, vector<1x16x128xf32>,
    %61 = vector.extract_strided_slice %56 {offsets = [16, 0], sizes = [16, 128], strides = [1, 1]} : vector<32x128xf32> to vector<16x128xf32>
    %c1_52 = arith.constant 1 : index
    %c0_53 = arith.constant 0 : index
    %c0_54 = arith.constant 0 : index
    %62 = vector.load %arg6[%c1_52, %c0_53, %c0_54] : memref<2x16x128xf32, #tpu.memory_space<vmem>>, vector<1x16x128xf32>
    %63 = vector.shape_cast %62 : vector<1x16x128xf32> to vector<16x128xf32>
    %64 = vector.shape_cast %61 : vector<16x128xf32> to vector<1x16x128xf32>
    tpu.vector_store %arg6[%c1_52, %c0_53, %c0_54], %64 {strides = array<i32>} : memref<2x16x128xf32, #tpu.memory_space<vmem>>, vector<1x16x128xf32>,
    return
  }
  func.func @transform_0(%arg0: i32) -> (i32, i32, i32) {
    %c0_i32 = arith.constant 0 : i32
    %c0_i32_0 = arith.constant 0 : i32
    %c0_i32_1 = arith.constant 0 : i32
    %c0_i32_2 = arith.constant 0 : i32
    return %c0_i32, %c0_i32_0, %c0_i32_1 : i32, i32, i32
  }
  func.func @transform_1(%arg0: i32) -> (i32, i32) {
    %c0_i32 = arith.constant 0 : i32
    %c0_i32_0 = arith.constant 0 : i32
    %c0_i32_1 = arith.constant 0 : i32
    return %c0_i32, %c0_i32_0 : i32, i32
  }
  func.func @transform_2(%arg0: i32) -> (i32, i32) {
    %c0_i32 = arith.constant 0 : i32
    %c0_i32_0 = arith.constant 0 : i32
    %c0_i32_1 = arith.constant 0 : i32
    return %c0_i32, %c0_i32_0 : i32, i32
  }
  func.func @transform_3(%arg0: i32) -> (i32, i32) {
    %c0_i32 = arith.constant 0 : i32
    %c0_i32_0 = arith.constant 0 : i32
    %c0_i32_1 = arith.constant 0 : i32
    return %c0_i32, %c0_i32_0 : i32, i32
  }
  func.func @transform_4(%arg0: i32) -> (i32, i32) {
    %c0_i32 = arith.constant 0 : i32
    %c0_i32_0 = arith.constant 0 : i32
    %c0_i32_1 = arith.constant 0 : i32
    return %c0_i32, %c0_i32_0 : i32, i32
  }
  func.func @transform_5(%arg0: i32) -> (i32, i32, i32) {
    %c0_i32 = arith.constant 0 : i32
    %c0_i32_0 = arith.constant 0 : i32
    %c0_i32_1 = arith.constant 0 : i32
    %c0_i32_2 = arith.constant 0 : i32
    return %c0_i32, %c0_i32_0, %c0_i32_1 : i32, i32, i32
  }
}

</mosaic_0001>

<bundles_post_ra>
// kernel: tile.23
= control target key start
LH: loop header
LB: loop body
LE: loop exit
PB: predicated region body
PF: predicated region fallthrough
CT: control target
= control target key end

     0   :  { %s28_s0 = inlined_call_operand.vmem [shape: f32[8], index: 0, kind: input, shape index: {}]   ;;  %s29_s1 = inlined_call_operand.vmem [shape: f32[16,8], index: 1, kind: output, shape index: {}]  }
   0x1   :  { %v4_v0 = vld [vmem:[%s28_s0] ss:$0 sm:$0xff] }
   0x2   :  { %5 = vst [vmem:[%s29_s1] sm:$0xff] %v4_v0  ;;  %8 = vst [vmem:[%s29_s1 + $0x8] sm:$0xff] %v4_v0 }

// kernel: tile.24
= control target key start
LH: loop header
LB: loop body
LE: loop exit
PB: predicated region body
PF: predicated region fallthrough
CT: control target
= control target key end

     0   :  { %s131_s10 = smov 120   ;;  %s132_s11 = smov 104   ;;  %vm3_vm0 = vcmask 64512   ;;  %vm9_vm1 = vcmask 1048512   ;;  %vm15_vm2 = vcmask 982912   ;;  %vm21_vm3 = vcmask 917312   ;;  %s207_s0 = inlined_call_operand.vmem [shape: f32[16,8], index: 0, kind: input, shape index: {}]   ;;  %s208_s1 = inlined_call_operand.vmem [shape: f32[1,128], index: 1, kind: output, shape index: {}]  }
   0x1   :  { %v101_v0 = vld [vmem:[%s207_s0 + $0xf] sm:$0x1]   ;;  %v103_v1 = vld [vmem:[%s207_s0 + $0xd] sm:$0x1]   ;;  %v102_v2 = vld [vmem:[%s207_s0 + $0xe] sm:$0x1]  }
   0x2   :  { %7 = vrot.lane.b32.xlu0 %v101_v0, %s131_s10  ;;  %19 = vrot.lane.b32.xlu1 %v103_v1, %s132_s11  ;;  %v104_v3 = vld [vmem:[%s207_s0 + $0xc] sm:$0x1]   ;;  %s133_s16 = smov 112   ;;  %s134_s17 = smov 96   ;;  %v105_v4 = vld [vmem:[%s207_s0 + $0xb] sm:$0x1]  }
   0x3   :  { %v106_v5 = vld [vmem:[%s207_s0 + $0xa] sm:$0x1]   ;;  %v2_v6 = vld [vmem:[%s207_s0] sm:$0x1]   ;;  %s135_s24 = smov 88   ;;  %s136_s25 = smov 80  }
   0x4   :  { %4 = vst.msk [vmem:[#allocation0] sm:$0x1] %vm3_vm0, %v2_v6   ;;  %v107_v7 = vld [vmem:[%s207_s0 + $0x9] sm:$0x1]   ;;  %v108_v8 = vld [vmem:[%s207_s0 + $0x8] sm:$0x1]  }
   0x5   :  { %s137_s30 = smov 72   ;;  %s138_s2 = smov 64   ;;  %v109_v9 = vld [vmem:[%s207_s0 + $0x7] sm:$0x1]   ;;  %v110_v10 = vld [vmem:[%s207_s0 + $0x6] sm:$0x1]  }
   0x6   :  { %13 = vrot.lane.b32.xlu0 %v102_v2, %s133_s16  ;;  %25 = vrot.lane.b32.xlu1 %v104_v3, %s134_s17  ;;  %s139_s7 = smov 56   ;;  %s140_s8 = smov 48   ;;  %v111_v11 = vld [vmem:[%s207_s0 + $0x5] sm:$0x1]   ;;  %v112_v12 = vld [vmem:[%s207_s0 + $0x4] sm:$0x1]  }
   0x7   :  { %s141_s13 = smov 40   ;;  %s142_s14 = smov 32   ;;  %v113_v13 = vld [vmem:[%s207_s0 + $0x3] sm:$0x1]   ;;  %v114_v14 = vld [vmem:[%s207_s0 + $0x2] sm:$0x1]  }
   0x8   :  { %s143_s19 = smov 24   ;;  %s144_s20 = smov 16   ;;  %v115_v15 = vld [vmem:[%s207_s0 + $0x1] sm:$0x1]   ;;  %vm27_vm4 = vcmask 851712   ;;  %vm33_vm5 = vcmask 786112  }
   0x9   :  { %s145_s0 = smov 8   ;;  %vm39_vm6 = vcmask 720512   ;;  %vm45_vm7 = vcmask 654912   ;;  %vm51_vm8 = vcmask 589312   ;;  %vm57_vm9 = vcmask 523712  }
   0xa   :  { %31 = vrot.lane.b32.xlu0 %v105_v4, %s135_s24  ;;  %37 = vrot.lane.b32.xlu1 %v106_v5, %s136_s25  ;;  %vm63_vm10 = vcmask 458112   ;;  %vm69_vm11 = vcmask 392512   ;;  %vm75_vm12 = vcmask 326912   ;;  %vm81_vm13 = vcmask 261312  }
   0xb   :  { %vm87_vm14 = vcmask 195712   ;;  %vm93_vm15 = vcmask 130112  }
   0xe   :  { %43 = vrot.lane.b32.xlu0 %v107_v7, %s137_s30  ;;  %49 = vrot.lane.b32.xlu1 %v108_v8, %s138_s2 }
  0x12   :  { %55 = vrot.lane.b32.xlu0 %v109_v9, %s139_s7  ;;  %61 = vrot.lane.b32.xlu1 %v110_v10, %s140_s8 }
  0x16   :  { %67 = vrot.lane.b32.xlu0 %v111_v11, %s141_s13  ;;  %73 = vrot.lane.b32.xlu1 %v112_v12, %s142_s14 }
  0x1a   :  { %79 = vrot.lane.b32.xlu0 %v113_v13, %s143_s19  ;;  %85 = vrot.lane.b32.xlu1 %v114_v14, %s144_s20 }
  0x1e   :  { %91 = vrot.lane.b32.xlu0 %v115_v15, %s145_s0 }
  0x74   :  { %v8_v16 = vpop.permute.xlu0 %7   ;;  %v20_v17 = vpop.permute.xlu1 %19  }
  0x75   :  { %10 = vst.msk [vmem:[#allocation0] sm:$0x1] %vm9_vm1, %v8_v16  }
  0x78   :  { %v14_v18 = vpop.permute.xlu0 %13   ;;  %v26_v19 = vpop.permute.xlu1 %25  }
  0x79   :  { %16 = vst.msk [vmem:[#allocation0] sm:$0x1] %vm15_vm2, %v14_v18  }
  0x7a   :  { %22 = vst.msk [vmem:[#allocation0] sm:$0x1] %vm21_vm3, %v20_v17  }
  0x7b   :  { %28 = vst.msk [vmem:[#allocation0] sm:$0x1] %vm27_vm4, %v26_v19  }
  0x7c   :  { %v32_v20 = vpop.permute.xlu0 %31   ;;  %v38_v21 = vpop.permute.xlu1 %37  }
  0x7d   :  { %34 = vst.msk [vmem:[#allocation0] sm:$0x1] %vm33_vm5, %v32_v20  }
  0x7e   :  { %40 = vst.msk [vmem:[#allocation0] sm:$0x1] %vm39_vm6, %v38_v21  }
  0x80   :  { %v44_v22 = vpop.permute.xlu0 %43   ;;  %v50_v23 = vpop.permute.xlu1 %49  }
  0x81   :  { %46 = vst.msk [vmem:[#allocation0] sm:$0x1] %vm45_vm7, %v44_v22  }
  0x82   :  { %52 = vst.msk [vmem:[#allocation0] sm:$0x1] %vm51_vm8, %v50_v23  }
  0x84   :  { %v56_v24 = vpop.permute.xlu0 %55   ;;  %v62_v25 = vpop.permute.xlu1 %61  }
  0x85   :  { %58 = vst.msk [vmem:[#allocation0] sm:$0x1] %vm57_vm9, %v56_v24  }
  0x86   :  { %64 = vst.msk [vmem:[#allocation0] sm:$0x1] %vm63_vm10, %v62_v25  }
  0x88   :  { %v68_v26 = vpop.permute.xlu0 %67   ;;  %v74_v27 = vpop.permute.xlu1 %73  }
  0x89   :  { %70 = vst.msk [vmem:[#allocation0] sm:$0x1] %vm69_vm11, %v68_v26  }
  0x8a   :  { %76 = vst.msk [vmem:[#allocation0] sm:$0x1] %vm75_vm12, %v74_v27  }
  0x8c   :  { %v80_v28 = vpop.permute.xlu0 %79   ;;  %v86_v29 = vpop.permute.xlu1 %85  }
  0x8d   :  { %82 = vst.msk [vmem:[#allocation0] sm:$0x1] %vm81_vm13, %v80_v28  }
  0x8e   :  { %88 = vst.msk [vmem:[#allocation0] sm:$0x1] %vm87_vm14, %v86_v29  }
  0x90   :  { %v92_v30 = vpop.permute.xlu0 %91  }
  0x91   :  { %94 = vst.msk [vmem:[#allocation0] sm:$0x1] %vm93_vm15, %v92_v30  }
  0x98   :  { %v98_v31 = vld [vmem:[#allocation0] sm:$0x1] }
  0x99   :  { %100 = vst [vmem:[%s208_s1] sm:$0x1] %v98_v31 }

// kernel: conv_block_forward.2
= control target key start
LH: loop header
LB: loop body
LE: loop exit
PB: predicated region body
PF: predicated region fallthrough
CT: control target
= control target key end

     0   :  { %v979_v1 = vmov 0   ;;  %vm43_vm0 = vsmask.f32 7938  ;;  %vm73_vm1 = vsmask.f32 7424  ;;  %vm42_vm2 = vcmask 523264   ;;  %s1213_s1 = inlined_call_operand.vmem [shape: bf16[384,128], index: 1, kind: input, shape index: {}]   ;;  %s1214_s0 = inlined_call_operand.vmem [shape: bf16[2,16,64], index: 0, kind: input, shape index: {}]   ;;  %s1215_s2 = inlined_call_operand.vmem [shape: f32[128,128], index: 2, kind: input, shape index: {}]   ;;  %s1216_s3 = inlined_call_operand.vmem [shape: f32[1,128], index: 3, kind: input, shape index: {}]   ;;  %s1217_s4 = inlined_call_operand.vmem [shape: f32[1,128], index: 4, kind: input, shape index: {}]   ;;  %s1218_s5 = inlined_call_operand.vmem [shape: bf16[2,16,128], index: 5, kind: output, shape index: {}]  }
   0x1   :  { %v945_v0 = vld [vmem:[%s1213_s1 + $0x40] sm:$0xff]   ;;  %22 = vst [vmem:[#allocation2 + $0x8] sm:$0xff] %v979_v1  ;;  %25 = vst [vmem:[#allocation2 + $0x20] sm:$0xff] %v979_v1  ;;  %v948_v4 = vld [vmem:[%s1213_s1 + $0x48] sm:$0xff]   ;;  %v980_v45 = vmov 0.0|0.0   ;;  %vm981_vm5 = vmmov 0  }
   0x2   :  { %v946_v2 = vld [vmem:[%s1213_s1] sm:$0xff]   ;;  %731 = vmatprep.subr.bf16.mxu0 %v945_v0  ;;  %v949_v5 = vld [vmem:[%s1213_s1 + $0x8] sm:$0xff]   ;;  %v951_v7 = vld [vmem:[%s1213_s1 + $0x50] sm:$0xff]  }
   0x3   :  { %v947_v3 = vld [vmem:[%s1213_s1 + $0x80] sm:$0xff]   ;;  %732 = vmatpush3.bf16.msra.mxu0 %v946_v2  ;;  %v950_v6 = vld [vmem:[%s1213_s1 + $0x88] sm:$0xff]   ;;  %v952_v8 = vld [vmem:[%s1213_s1 + $0x10] sm:$0xff]  }
   0x4   :  { %803 = vmatprep.subr.bf16.mxu1 %v947_v3  ;;  %733 = vmatprep.subr.bf16.mxu0 %v948_v4  ;;  %v953_v9 = vld [vmem:[%s1213_s1 + $0x90] sm:$0xff]   ;;  %v954_v10 = vld [vmem:[%s1213_s1 + $0x58] sm:$0xff]   ;;  %v957_v13 = vld [vmem:[%s1213_s1 + $0x60] sm:$0xff]  }
   0x5   :  { %804 = vmatpush3.bf16.msra.mxu1 %v947_v3  ;;  %v955_v11 = vld [vmem:[%s1213_s1 + $0x18] sm:$0xff]   ;;  %v959_v14 = vld [vmem:[%s1213_s1 + $0xa0] sm:$0xff]   ;;  %v960_v16 = vld [vmem:[%s1213_s1 + $0x68] sm:$0xff]  }
   0x6   :  { %805 = vmatprep.subr.bf16.mxu1 %v950_v6  ;;  %v956_v12 = vld [vmem:[%s1213_s1 + $0x98] sm:$0xff]   ;;  %v958_v15 = vld [vmem:[%s1213_s1 + $0x20] sm:$0xff]   ;;  %v962_v17 = vld [vmem:[%s1213_s1 + $0xa8] sm:$0xff]  }
   0x7   :  { %734 = vmatpush3.bf16.msra.mxu0 %v949_v5  ;;  %v961_v18 = vld [vmem:[%s1213_s1 + $0x28] sm:$0xff]   ;;  %v963_v19 = vld [vmem:[%s1213_s1 + $0x70] sm:$0xff]   ;;  %v966_v22 = vld [vmem:[%s1213_s1 + $0x78] sm:$0xff]  }
   0x8   :  { %735 = vmatprep.subr.bf16.mxu0 %v951_v7  ;;  %v964_v20 = vld [vmem:[%s1213_s1 + $0x30] sm:$0xff]   ;;  %v969_v23 = vld [vmem:[%s1214_s0] sm:$0xff]   ;;  %v968_v25 = vld [vmem:[%s1213_s1 + $0xb8] sm:$0xff]  }
   0x9   :  { %806 = vmatpush3.bf16.msra.mxu1 %v950_v6  ;;  %v965_v21 = vld [vmem:[%s1213_s1 + $0xb0] sm:$0xff]   ;;  %v970_v24 = vld [vmem:[%s1214_s0] sm:$0xff]   ;;  %57 = vst.msk [vmem:[#allocation2 + $0x8] sm:$0xff] %vm42_vm2, %v969_v23  ;;  %v967_v26 = vld [vmem:[%s1213_s1 + $0x38] sm:$0xff]  }
   0xa   :  { %807 = vmatprep.subr.bf16.mxu1 %v953_v9  ;;  %v35_v27 = vshrl.u32 %v970_v24, 16  ;;  %v38_v28 = vshll.u32 %v970_v24, 16  ;;  %v971_v29 = vld [vmem:[%s1214_s0] sm:$0xff]   ;;  %v972_v30 = vld [vmem:[%s1214_s0 + $0x8] sm:$0xff]   ;;  %vm1103_vm3 = vmand %vm42_vm2, %vm43_vm0 }
   0xb   :  { %736 = vmatpush3.bf16.msra.mxu0 %v952_v8  ;;  %v66_v32 = vshrl.u32 %v971_v29, 16  ;;  %v68_v33 = vshll.u32 %v971_v29, 16  ;;  %v973_v34 = vld [vmem:[%s1214_s0 + $0x8] sm:$0xff]   ;;  %v114_v36 = vshrl.u32 %v972_v30, 16  ;;  %v116_v37 = vshll.u32 %v972_v30, 16  ;;  %v442_v41 = vld [vmem:[%s1215_s2] sm:$0xff]  ;;  %vm1119_vm4 = vmand %vm42_vm2, %vm73_vm1 }
   0xc   :  { %737 = vmatprep.subr.bf16.mxu0 %v954_v10  ;;  %v37_v31 = vrot.slane %v35_v27, 7  ;;  %105 = vst.msk [vmem:[#allocation2 + $0x20] sm:$0xff] %vm42_vm2, %v973_v34  ;;  %v974_v40 = vld [vmem:[%s1214_s0 + $0x8] sm:$0xff]   ;;  %v444_v59 = vld [vmem:[%s1215_s2 + $0x10] sm:$0xff]  ;;  %v445_v60 = vld [vmem:[%s1215_s2 + $0x18] sm:$0xff] }
   0xd   :  { %808 = vmatpush3.bf16.msra.mxu1 %v953_v9  ;;  %v70_v39 = vrot.slane %v68_v33, 1  ;;  %v443_v42 = vld [vmem:[%s1215_s2 + $0x8] sm:$0xff]  ;;  %v118_v44 = vrot.slane %v116_v37, 1  ;;  %v87_v50 = vshrl.u32 %v974_v40, 16  ;;  %v90_v51 = vshll.u32 %v974_v40, 16  ;;  %v446_v62 = vld [vmem:[%s1215_s2 + $0x20] sm:$0xff] }
   0xe   :  { %809 = vmatprep.subr.bf16.mxu1 %v956_v12  ;;  %v40_v38 = vor.u32 %v38_v28, %v37_v31  ;;  %v894_v46 = vpack.c.bf16 %v443_v42, %v442_v41  ;;  %v897_v61 = vpack.c.bf16 %v445_v60, %v444_v59  ;;  %v447_v63 = vld [vmem:[%s1215_s2 + $0x28] sm:$0xff]  ;;  %v448_v1 = vld [vmem:[%s1215_s2 + $0x30] sm:$0xff]  ;;  %v449_v2 = vld [vmem:[%s1215_s2 + $0x38] sm:$0xff] }
   0xf   :  { %738 = vmatpush3.bf16.msra.mxu0 %v955_v11  ;;  %v71_v49 = vor.u32 %v70_v39, %v66_v32  ;;  %v119_v52 = vor.u32 %v118_v44, %v114_v36  ;;  %v89_v54 = vrot.slane %v87_v50, 7  ;;  %v900_v0 = vpack.c.bf16 %v447_v63, %v446_v62  ;;  %v450_v4 = vld [vmem:[%s1215_s2 + $0x40] sm:$0xff]  ;;  %v451_v5 = vld [vmem:[%s1215_s2 + $0x48] sm:$0xff]  ;;  %v452_v7 = vld [vmem:[%s1215_s2 + $0x50] sm:$0xff] }
  0x10   :  { %739 = vmatprep.subr.bf16.mxu0 %v957_v13  ;;  %v125_v47 = vld [vmem:[#allocation2 + $0x8] sm:$0xff]  ;;  %v46_v48 = vsel %vm1103_vm3, %v40_v38, 0  ;;  %v903_v3 = vpack.c.bf16 %v449_v2, %v448_v1  ;;  %v906_v6 = vpack.c.bf16 %v451_v5, %v450_v4  ;;  %v453_v8 = vld [vmem:[%s1215_s2 + $0x58] sm:$0xff]  ;;  %v454_v10 = vld [vmem:[%s1215_s2 + $0x60] sm:$0xff] }
  0x11   :  { %810 = vmatpush3.bf16.msra.mxu1 %v956_v12  ;;  %354 = vmatprep.mubr.bf16.mxu0 %v125_v47  ;;  %v76_v53 = vsel %vm1119_vm4, %v71_v49, 0  ;;  %v122_v55 = vsel %vm1119_vm4, %v119_v52, 0  ;;  %v92_v56 = vor.u32 %v90_v51, %v89_v54  ;;  %v909_v9 = vpack.c.bf16 %v453_v8, %v452_v7  ;;  %v455_v11 = vld [vmem:[%s1215_s2 + $0x68] sm:$0xff]  ;;  %v456_v13 = vld [vmem:[%s1215_s2 + $0x70] sm:$0xff] }
  0x12   :  { %811 = vmatprep.subr.bf16.mxu1 %v959_v14  ;;  %819 = vmatprep.mubr.bf16.mxu1 %v76_v53  ;;  %v912_v12 = vpack.c.bf16 %v455_v11, %v454_v10  ;;  %v618_v10 = vlaneseq }
  0x13   :  { %740 = vmatpush3.bf16.msra.mxu0 %v958_v15  ;;  %v128_v57 = vld [vmem:[#allocation2 + $0x20] sm:$0xff]  ;;  %v95_v58 = vsel %vm1103_vm3, %v92_v56, 0 }
  0x14   :  { %741 = vmatprep.subr.bf16.mxu0 %v960_v16  ;;  %v982_v16 = vmov 0.0   ;;  %v619_v11 = vshrl.u32 %v618_v10, 7 }
  0x15   :  { %812 = vmatpush3.bf16.msra.mxu1 %v959_v14  ;;  %v457_v14 = vld [vmem:[%s1215_s2 + $0x78] sm:$0xff] }
  0x16   :  { %813 = vmatprep.subr.bf16.mxu1 %v962_v17  ;;  %v915_v15 = vpack.c.bf16 %v457_v14, %v456_v13  ;;  %v620_v13 = vsub.s32 0, %v619_v11 }
  0x17   :  { %742 = vmatpush3.bf16.msra.mxu0 %v961_v18 }
  0x18   :  { %743 = vmatprep.subr.bf16.mxu0 %v963_v19 }
  0x19   :  { %814 = vmatpush3.bf16.msra.mxu1 %v962_v17 }
  0x1a   :  { %815 = vmatprep.subr.bf16.mxu1 %v965_v21 }
  0x1b   :  { %744 = vmatpush3.bf16.msra.mxu0 %v964_v20 }
  0x1c   :  { %745 = vmatprep.subr.bf16.mxu0 %v966_v22 }
  0x1d   :  { %816 = vmatpush3.bf16.msra.mxu1 %v965_v21 }
  0x1e   :  { %817 = vmatprep.subr.bf16.mxu1 %v968_v25 }
  0x1f   :  { %746 = vmatpush3.bf16.msra.mxu0 %v967_v26 }
  0x20   :  { %893 = vmatprep.subr.bf16.mxu0 %v980_v45 }
  0x21   :  { %818 = vmatpush3.bf16.msra.mxu1 %v968_v25 }
  0x22   :  { %917 = vmatprep.subr.bf16.mxu1 %v980_v45  ;;  %355 = vmatmul.mubr.bf16.vlgmr.msra.gmra.mrb[0].mxu0 %v46_v48 }
  0x23   :  { %895 = vmatpush3.bf16.msra.mxu0 %v894_v46  ;;  %362 = vmatprep.mubr.bf16.mxu0 %v128_v57 }
  0x24   :  { %820 = vmatmul.mubr.bf16.vlgmr.msra.gmra.mrb[0].mxu1 %v122_v55  ;;  %896 = vmatprep.subr.bf16.mxu0 %v980_v45 }
  0x25   :  { %919 = vmatpush3.bf16.msra.mxu1 %v894_v46  ;;  %890 = vmatprep.mubr.msk.f32.mxu1 %vm981_vm5, %v982_v16 }
  0x26   :  { %920 = vmatprep.subr.bf16.mxu1 %v980_v45 }
  0x27   :  { %898 = vmatpush3.bf16.msra.mxu0 %v897_v61 }
  0x28   :  { %899 = vmatprep.subr.bf16.mxu0 %v980_v45 }
  0x29   :  { %922 = vmatpush3.bf16.msra.mxu1 %v897_v61 }
  0x2a   :  { %363 = vmatmul.mubr.bf16.gmra.mrb[4].mxu0 %v95_v58  ;;  %923 = vmatprep.subr.bf16.mxu1 %v980_v45 }
  0x2b   :  { %901 = vmatpush3.bf16.msra.mxu0 %v900_v0  ;;  %855 = vmatprep.mubr.msk.f32.mxu0 %vm981_vm5, %v982_v16  ;;  %v614_v16 = vld [vmem:[%s1217_s4] sm:$0x1] }
  0x2c   :  { %902 = vmatprep.subr.bf16.mxu0 %v980_v45 }
  0x2d   :  { %925 = vmatpush3.bf16.msra.mxu1 %v900_v0 }
  0x2e   :  { %926 = vmatprep.subr.bf16.mxu1 %v980_v45 }
  0x2f   :  { %904 = vmatpush3.bf16.msra.mxu0 %v903_v3 }
  0x30   :  { %905 = vmatprep.subr.bf16.mxu0 %v980_v45 }
  0x31   :  { %928 = vmatpush3.bf16.msra.mxu1 %v903_v3 }
  0x32   :  { %929 = vmatprep.subr.bf16.mxu1 %v980_v45 }
  0x33   :  { %907 = vmatpush3.bf16.msra.mxu0 %v906_v6 }
  0x34   :  { %908 = vmatprep.subr.bf16.mxu0 %v980_v45 }
  0x35   :  { %931 = vmatpush3.bf16.msra.mxu1 %v906_v6 }
  0x36   :  { %932 = vmatprep.subr.bf16.mxu1 %v980_v45 }
  0x37   :  { %910 = vmatpush3.bf16.msra.mxu0 %v909_v9 }
  0x38   :  { %911 = vmatprep.subr.bf16.mxu0 %v980_v45 }
  0x39   :  { %934 = vmatpush3.bf16.msra.mxu1 %v909_v9 }
  0x3a   :  { %935 = vmatprep.subr.bf16.mxu1 %v980_v45 }
  0x3b   :  { %913 = vmatpush3.bf16.msra.mxu0 %v912_v12 }
  0x3c   :  { %914 = vmatprep.subr.bf16.mxu0 %v980_v45 }
  0x3d   :  { %937 = vmatpush3.bf16.msra.mxu1 %v912_v12  ;;  %v603_v12 = vld [vmem:[%s1216_s3] sm:$0x1] }
  0x3e   :  { %938 = vmatprep.subr.bf16.mxu1 %v980_v45 }
  0x3f   :  { %916 = vmatpush3.bf16.msra.mxu0 %v915_v15 }
  0x41   :  { %940 = vmatpush3.bf16.msra.mxu1 %v915_v15 }
  0xf5   :  { %v747_v17 = vpop.f32.mrb[0].mxu0 }
  0xf6   :  { %v748_v18 = vpop.f32.mrb[1].mxu0 }
  0xf7   :  { %v749_v19 = vadd.f32 %v748_v18, %v747_v17  ;;  %v750_v20 = vpop.f32.mrb[2].mxu0  ;;  %v821_v21 = vpop.f32.mrb[0].mxu1 }
  0xf8   :  { %v751_v22 = vpop.f32.mrb[3].mxu0  ;;  %v405_v23 = vpop.f32.mrb[1].mxu1 }
  0xf9   :  { %v752_v24 = vadd.f32 %v751_v22, %v750_v20  ;;  %v1189_v25 = vadd.f32 %v749_v19, %v405_v23  ;;  %v822_v26 = vpop.f32.mrb[2].mxu1 }
  0xfa   :  { %v408_v27 = vpop.f32.mrb[3].mxu1 }
  0xfb   :  { %v1191_v28 = vadd.f32 %v752_v24, %v408_v27  ;;  %v429_v35 = vmul.f32 %v1189_v25, %v1189_v25 }
  0xfd   :  { %v753_v29 = vpop.f32.mrb[4].mxu0  ;;  %v430_v31 = vmul.f32 %v1191_v28, %v1191_v28  ;;  %v420_v36 = vadd.f32 %v1191_v28, %v1189_v25 }
  0xfe   :  { %v754_v30 = vpop.f32.mrb[5].mxu0 }
  0xff   :  { %v755_v32 = vadd.f32 %v754_v30, %v753_v29  ;;  %v756_v33 = vpop.f32.mrb[6].mxu0  ;;  %v433_v39 = vadd.f32 %v430_v31, %v429_v35 }
 0x100   :  { %v757_v34 = vpop.f32.mrb[7].mxu0 }
 0x101   :  { %v414_v37 = vadd.f32 %v821_v21, %v755_v32  ;;  %v758_v38 = vadd.f32 %v757_v34, %v756_v33 }
 0x103   :  { %v421_v40 = vadd.f32 %v420_v36, %v414_v37  ;;  %v431_v41 = vmul.f32 %v414_v37, %v414_v37  ;;  %v417_v42 = vadd.f32 %v822_v26, %v758_v38 }
 0x105   :  { %v434_v43 = vadd.f32 %v433_v39, %v431_v41  ;;  %v422_v44 = vadd.f32 %v421_v40, %v417_v42  ;;  %v432_v45 = vmul.f32 %v417_v42, %v417_v42 }
 0x107   :  { %v423_v46 = vrot.slane %v422_v44, 4  ;;  %v435_v47 = vadd.f32 %v434_v43, %v432_v45 }
 0x109   :  { %v424_v48 = vadd.f32 %v423_v46, %v422_v44  ;;  %v436_v49 = vrot.slane %v435_v47, 4 }
 0x10b   :  { %v425_v50 = vrot.slane %v424_v48, 2  ;;  %v437_v51 = vadd.f32 %v436_v49, %v435_v47 }
 0x10d   :  { %v426_v52 = vadd.f32 %v425_v50, %v424_v48  ;;  %v438_v53 = vrot.slane %v437_v51, 2 }
 0x10f   :  { %v427_v54 = vrot.slane %v426_v52, 1  ;;  %v439_v55 = vadd.f32 %v438_v53, %v437_v51 }
 0x111   :  { %v428_v56 = vadd.f32 %v427_v54, %v426_v52  ;;  %v440_v57 = vrot.slane %v439_v55, 1 }
 0x113   :  { %856 = vmatmul.mubr.f32.vlgmr.msra.gmra.mrb[8].mxu0 %v428_v56  ;;  %v441_v58 = vadd.f32 %v440_v57, %v439_v55 }
 0x115   :  { %891 = vmatmul.mubr.f32.vlgmr.msra.gmra.mrb[4].mxu1 %v441_v58 }
 0x1e6   :  { %v524_v59 = vpop.f32.mrb[8].mxu0 }
 0x1e7   :  { %v598_v60 = vmul.f32 0.001953125, %v524_v59  ;;  %v857_v61 = vpop.f32.mrb[9].mxu0 }
 0x1e8   :  { %v594_v62 = vpop.f32.mrb[4].mxu1 }
 0x1e9   :  { %v600_v63 = vmul.f32 %v598_v60, %v598_v60  ;;  %v599_v0 = vmul.f32 0.001953125, %v594_v62  ;;  %v892_v1 = vpop.f32.mrb[5].mxu1 }
 0x1eb   :  { %v601_v2 = vsub.f32 %v599_v0, %v600_v63 }
 0x1ed   :  { %v602_v3 = vmax.f32 %v601_v2, 0.0 }
 0x1ef   :  { %v604_v4 = vadd.f32 1e-05, %v602_v3 }
 0x1f1   :  { %975 = vrsqrt.f32 %v604_v4  ;;  %vm607_vm6 = vcmp.eq.f32.partialorder %v604_v4, inf  ;;  %v610_v7 = vand.u32 2147483648, %v604_v4  ;;  %vm609_vm7 = vcmp.eq.f32.partialorder %v604_v4, 0.0 }
 0x1fb   :  { %v976_v5 = vpop.eup %975 }
 0x1fc   :  { %v606_v6 = vmul.f32 %v976_v5, %v604_v4 }
 0x1fe   :  { %v608_v8 = vsel %vm607_vm6, %v604_v4, %v606_v6 }
 0x1ff   :  { %v611_v9 = vsel %vm609_vm7, %v610_v7, %v608_v8 }
 0x200   :  { %977 = vrcp.f32 %v611_v9 }
 0x20a   :  { %v978_v14 = vpop.eup %977 }
 0x20b   :  { %v613_v15 = vmul.f32 %v978_v14, %v603_v12 }
 0x20d   :  { %v615_v17 = vmul.f32 %v613_v15, %v598_v60  ;;  %v621_v18 = vrot.slane %v613_v15, %v620_v13 }
 0x20f   :  { %v616_v19 = vsub.f32 %v614_v16, %v615_v17  ;;  %v623_v20 = vmul.f32 %v621_v18, %v1189_v25  ;;  %v624_v21 = vmul.f32 %v621_v18, %v1191_v28  ;;  %v625_v22 = vmul.f32 %v621_v18, %v414_v37 }
 0x210   :  { %v626_v23 = vmul.f32 %v621_v18, %v417_v42 }
 0x211   :  { %v631_v24 = vrot.slane %v616_v19, %v620_v13 }
 0x213   :  { %v633_v26 = vadd.f32 %v631_v24, %v623_v20  ;;  %v634_v27 = vadd.f32 %v631_v24, %v624_v21  ;;  %v635_v29 = vadd.f32 %v631_v24, %v625_v22  ;;  %v636_v30 = vadd.f32 %v631_v24, %v626_v23 }
 0x215   :  { %vm637_vm8 = vcmp.ge.f32.partialorder %v633_v26, 0.0  ;;  %vm638_vm9 = vcmp.ge.f32.partialorder %v634_v27, 0.0  ;;  %vm639_vm10 = vcmp.ge.f32.partialorder %v635_v29, 0.0  ;;  %vm640_vm11 = vcmp.ge.f32.partialorder %v636_v30, 0.0 }
 0x216   :  { %v641_v31 = vmul.f32 0.1, %v633_v26  ;;  %v642_v32 = vmul.f32 0.1, %v634_v27  ;;  %v643_v33 = vmul.f32 0.1, %v635_v29 }
 0x217   :  { %v644_v34 = vmul.f32 0.1, %v636_v30 }
 0x218   :  { %v645_v35 = vsel %vm637_vm8, %v633_v26, %v641_v31  ;;  %v646_v36 = vsel %vm638_vm9, %v634_v27, %v642_v32  ;;  %v647_v25 = vsel %vm639_vm10, %v635_v29, %v643_v33 }
 0x219   :  { %v648_v38 = vsel %vm640_vm11, %v636_v30, %v644_v34  ;;  %v723_v28 = vpack.c.bf16 %v646_v36, %v645_v35 }
 0x21a   :  { %v728_v37 = vpack.c.bf16 %v648_v38, %v647_v25 }
 0x21b   :  { %724 = vst [vmem:[%s1218_s5] sm:$0xff] %v723_v28  }
 0x21c   :  { %730 = vst [vmem:[%s1218_s5 + $0x8] sm:$0xff] %v728_v37  }

// kernel: conv_block_forward.3
= control target key start
LH: loop header
LB: loop body
LE: loop exit
PB: predicated region body
PF: predicated region fallthrough
CT: control target
= control target key end

     0   :  { %vm43_vm0 = vsmask.f32 7938  ;;  %vm72_vm1 = vsmask.f32 7424  ;;  %vm42_vm2 = vcmask 1047552   ;;  %v942_v44 = vmov 0.0|0.0   ;;  %s1179_s1 = inlined_call_operand.vmem [shape: bf16[384,128], index: 1, kind: input, shape index: {}]   ;;  %s1180_s0 = inlined_call_operand.vmem [shape: bf16[2,16,128], index: 0, kind: input, shape index: {}]   ;;  %s1181_s2 = inlined_call_operand.vmem [shape: f32[128,128], index: 2, kind: input, shape index: {}]   ;;  %s1182_s3 = inlined_call_operand.vmem [shape: f32[1,128], index: 3, kind: input, shape index: {}]   ;;  %s1183_s4 = inlined_call_operand.vmem [shape: f32[1,128], index: 4, kind: input, shape index: {}]   ;;  %s1184_s5 = inlined_call_operand.vmem [shape: f32[2,16,128], index: 5, kind: output, shape index: {}]  }
   0x1   :  { %v908_v0 = vld [vmem:[%s1179_s1 + $0x40] sm:$0xff]   ;;  %v911_v3 = vld [vmem:[%s1179_s1 + $0x48] sm:$0xff]   ;;  %v914_v6 = vld [vmem:[%s1179_s1 + $0x50] sm:$0xff]   ;;  %vm943_vm5 = vmmov 0  }
   0x2   :  { %v909_v1 = vld [vmem:[%s1179_s1] sm:$0xff]   ;;  %695 = vmatprep.subr.bf16.mxu0 %v908_v0  ;;  %v912_v4 = vld [vmem:[%s1179_s1 + $0x8] sm:$0xff]   ;;  %v915_v7 = vld [vmem:[%s1179_s1 + $0x10] sm:$0xff]  }
   0x3   :  { %v910_v2 = vld [vmem:[%s1179_s1 + $0x80] sm:$0xff]   ;;  %696 = vmatpush3.bf16.msra.mxu0 %v909_v1  ;;  %v913_v5 = vld [vmem:[%s1179_s1 + $0x88] sm:$0xff]   ;;  %v916_v8 = vld [vmem:[%s1179_s1 + $0x90] sm:$0xff]  }
   0x4   :  { %767 = vmatprep.subr.bf16.mxu1 %v910_v2  ;;  %697 = vmatprep.subr.bf16.mxu0 %v911_v3  ;;  %v917_v9 = vld [vmem:[%s1179_s1 + $0x58] sm:$0xff]   ;;  %v920_v12 = vld [vmem:[%s1179_s1 + $0x60] sm:$0xff]   ;;  %v923_v15 = vld [vmem:[%s1179_s1 + $0x68] sm:$0xff]  }
   0x5   :  { %768 = vmatpush3.bf16.msra.mxu1 %v910_v2  ;;  %v918_v10 = vld [vmem:[%s1179_s1 + $0x18] sm:$0xff]   ;;  %v922_v13 = vld [vmem:[%s1179_s1 + $0xa0] sm:$0xff]   ;;  %v925_v16 = vld [vmem:[%s1179_s1 + $0xa8] sm:$0xff]  }
   0x6   :  { %769 = vmatprep.subr.bf16.mxu1 %v913_v5  ;;  %v919_v11 = vld [vmem:[%s1179_s1 + $0x98] sm:$0xff]   ;;  %v921_v14 = vld [vmem:[%s1179_s1 + $0x20] sm:$0xff]   ;;  %v924_v17 = vld [vmem:[%s1179_s1 + $0x28] sm:$0xff]  }
   0x7   :  { %698 = vmatpush3.bf16.msra.mxu0 %v912_v4  ;;  %v926_v18 = vld [vmem:[%s1179_s1 + $0x70] sm:$0xff]   ;;  %v929_v21 = vld [vmem:[%s1179_s1 + $0x78] sm:$0xff]   ;;  %v932_v22 = vld [vmem:[%s1180_s0] sm:$0xff]  }
   0x8   :  { %699 = vmatprep.subr.bf16.mxu0 %v914_v6  ;;  %v927_v19 = vld [vmem:[%s1179_s1 + $0x30] sm:$0xff]   ;;  %v933_v23 = vld [vmem:[%s1180_s0] sm:$0xff]   ;;  %v931_v24 = vld [vmem:[%s1179_s1 + $0xb8] sm:$0xff]   ;;  %353 = vmatprep.mubr.bf16.mxu0 %v932_v22 }
   0x9   :  { %770 = vmatpush3.bf16.msra.mxu1 %v913_v5  ;;  %v928_v20 = vld [vmem:[%s1179_s1 + $0xb0] sm:$0xff]   ;;  %v930_v25 = vld [vmem:[%s1179_s1 + $0x38] sm:$0xff]   ;;  %v35_v26 = vshrl.u32 %v933_v23, 16  ;;  %v38_v27 = vshll.u32 %v933_v23, 16  ;;  %v934_v28 = vld [vmem:[%s1180_s0] sm:$0xff]  }
   0xa   :  { %771 = vmatprep.subr.bf16.mxu1 %v916_v8  ;;  %v935_v29 = vld [vmem:[%s1180_s0 + $0x8] sm:$0xff]   ;;  %v65_v31 = vshrl.u32 %v934_v28, 16  ;;  %v67_v32 = vshll.u32 %v934_v28, 16  ;;  %vm1064_vm3 = vmand %vm42_vm2, %vm43_vm0  ;;  %v441_v40 = vld [vmem:[%s1181_s2] sm:$0xff] }
   0xb   :  { %700 = vmatpush3.bf16.msra.mxu0 %v915_v7  ;;  %v37_v30 = vrot.slane %v35_v26, 7  ;;  %v936_v33 = vld [vmem:[%s1180_s0 + $0x8] sm:$0xff]   ;;  %v113_v35 = vshrl.u32 %v935_v29, 16  ;;  %v115_v36 = vshll.u32 %v935_v29, 16  ;;  %vm1079_vm4 = vmand %vm42_vm2, %vm72_vm1  ;;  %v443_v56 = vld [vmem:[%s1181_s2 + $0x10] sm:$0xff] }
   0xc   :  { %701 = vmatprep.subr.bf16.mxu0 %v917_v9  ;;  %v69_v38 = vrot.slane %v67_v32, 1  ;;  %v937_v39 = vld [vmem:[%s1180_s0 + $0x8] sm:$0xff]   ;;  %v444_v57 = vld [vmem:[%s1181_s2 + $0x18] sm:$0xff]  ;;  %v445_v59 = vld [vmem:[%s1181_s2 + $0x20] sm:$0xff] }
   0xd   :  { %772 = vmatpush3.bf16.msra.mxu1 %v916_v8  ;;  %v40_v37 = vor.u32 %v38_v27, %v37_v30  ;;  %v442_v41 = vld [vmem:[%s1181_s2 + $0x8] sm:$0xff]  ;;  %v117_v43 = vrot.slane %v115_v36, 1  ;;  %v86_v48 = vshrl.u32 %v937_v39, 16  ;;  %v89_v49 = vshll.u32 %v937_v39, 16  ;;  %v447_v62 = vld [vmem:[%s1181_s2 + $0x30] sm:$0xff]  ;;  %v448_v63 = vld [vmem:[%s1181_s2 + $0x38] sm:$0xff] }
   0xe   :  { %773 = vmatprep.subr.bf16.mxu1 %v919_v11  ;;  %v858_v45 = vpack.c.bf16 %v442_v41, %v441_v40  ;;  %v70_v47 = vor.u32 %v69_v38, %v65_v31  ;;  %v861_v58 = vpack.c.bf16 %v444_v57, %v443_v56  ;;  %v446_v60 = vld [vmem:[%s1181_s2 + $0x28] sm:$0xff]  ;;  %v867_v0 = vpack.c.bf16 %v448_v63, %v447_v62  ;;  %v449_v1 = vld [vmem:[%s1181_s2 + $0x40] sm:$0xff]  ;;  %v451_v4 = vld [vmem:[%s1181_s2 + $0x50] sm:$0xff] }
   0xf   :  { %702 = vmatpush3.bf16.msra.mxu0 %v918_v10  ;;  %v46_v46 = vsel %vm1064_vm3, %v40_v37, 0  ;;  %v118_v50 = vor.u32 %v117_v43, %v113_v35  ;;  %v88_v52 = vrot.slane %v86_v48, 7  ;;  %v864_v61 = vpack.c.bf16 %v446_v60, %v445_v59  ;;  %v450_v2 = vld [vmem:[%s1181_s2 + $0x48] sm:$0xff]  ;;  %v452_v5 = vld [vmem:[%s1181_s2 + $0x58] sm:$0xff]  ;;  %v453_v7 = vld [vmem:[%s1181_s2 + $0x60] sm:$0xff] }
  0x10   :  { %703 = vmatprep.subr.bf16.mxu0 %v920_v12  ;;  %v75_v51 = vsel %vm1079_vm4, %v70_v47, 0  ;;  %v870_v3 = vpack.c.bf16 %v450_v2, %v449_v1  ;;  %v873_v6 = vpack.c.bf16 %v452_v5, %v451_v4  ;;  %v454_v8 = vld [vmem:[%s1181_s2 + $0x68] sm:$0xff]  ;;  %v455_v10 = vld [vmem:[%s1181_s2 + $0x70] sm:$0xff] }
  0x11   :  { %774 = vmatpush3.bf16.msra.mxu1 %v919_v11  ;;  %783 = vmatprep.mubr.bf16.mxu1 %v75_v51  ;;  %v121_v53 = vsel %vm1079_vm4, %v118_v50, 0  ;;  %v91_v54 = vor.u32 %v89_v49, %v88_v52  ;;  %v876_v9 = vpack.c.bf16 %v454_v8, %v453_v7  ;;  %v456_v11 = vld [vmem:[%s1181_s2 + $0x78] sm:$0xff]  ;;  %v617_v7 = vlaneseq }
  0x12   :  { %775 = vmatprep.subr.bf16.mxu1 %v922_v13  ;;  %v879_v12 = vpack.c.bf16 %v456_v11, %v455_v10 }
  0x13   :  { %704 = vmatpush3.bf16.msra.mxu0 %v921_v14  ;;  %v94_v55 = vsel %vm1064_vm3, %v91_v54, 0  ;;  %v618_v8 = vshrl.u32 %v617_v7, 7 }
  0x14   :  { %705 = vmatprep.subr.bf16.mxu0 %v923_v15 }
  0x15   :  { %776 = vmatpush3.bf16.msra.mxu1 %v922_v13  ;;  %v944_v13 = vmov 0.0   ;;  %v619_v10 = vsub.s32 0, %v618_v8 }
  0x16   :  { %777 = vmatprep.subr.bf16.mxu1 %v925_v16 }
  0x17   :  { %706 = vmatpush3.bf16.msra.mxu0 %v924_v17 }
  0x18   :  { %707 = vmatprep.subr.bf16.mxu0 %v926_v18 }
  0x19   :  { %778 = vmatpush3.bf16.msra.mxu1 %v925_v16 }
  0x1a   :  { %779 = vmatprep.subr.bf16.mxu1 %v928_v20 }
  0x1b   :  { %708 = vmatpush3.bf16.msra.mxu0 %v927_v19 }
  0x1c   :  { %709 = vmatprep.subr.bf16.mxu0 %v929_v21 }
  0x1d   :  { %780 = vmatpush3.bf16.msra.mxu1 %v928_v20 }
  0x1e   :  { %781 = vmatprep.subr.bf16.mxu1 %v931_v24 }
  0x1f   :  { %710 = vmatpush3.bf16.msra.mxu0 %v930_v25 }
  0x20   :  { %857 = vmatprep.subr.bf16.mxu0 %v942_v44 }
  0x21   :  { %782 = vmatpush3.bf16.msra.mxu1 %v931_v24 }
  0x22   :  { %354 = vmatmul.mubr.bf16.vlgmr.msra.gmra.mrb[0].mxu0 %v46_v46  ;;  %881 = vmatprep.subr.bf16.mxu1 %v942_v44 }
  0x23   :  { %361 = vmatprep.mubr.bf16.mxu0 %v936_v33  ;;  %859 = vmatpush3.bf16.msra.mxu0 %v858_v45 }
  0x24   :  { %860 = vmatprep.subr.bf16.mxu0 %v942_v44  ;;  %784 = vmatmul.mubr.bf16.vlgmr.msra.gmra.mrb[0].mxu1 %v121_v53 }
  0x25   :  { %883 = vmatpush3.bf16.msra.mxu1 %v858_v45  ;;  %854 = vmatprep.mubr.msk.f32.mxu1 %vm943_vm5, %v944_v13 }
  0x26   :  { %884 = vmatprep.subr.bf16.mxu1 %v942_v44 }
  0x27   :  { %862 = vmatpush3.bf16.msra.mxu0 %v861_v58 }
  0x28   :  { %863 = vmatprep.subr.bf16.mxu0 %v942_v44 }
  0x29   :  { %886 = vmatpush3.bf16.msra.mxu1 %v861_v58 }
  0x2a   :  { %362 = vmatmul.mubr.bf16.gmra.mrb[4].mxu0 %v94_v55  ;;  %887 = vmatprep.subr.bf16.mxu1 %v942_v44 }
  0x2b   :  { %865 = vmatpush3.bf16.msra.mxu0 %v864_v61  ;;  %819 = vmatprep.mubr.msk.f32.mxu0 %vm943_vm5, %v944_v13  ;;  %v613_v13 = vld [vmem:[%s1183_s4] sm:$0x1] }
  0x2c   :  { %866 = vmatprep.subr.bf16.mxu0 %v942_v44 }
  0x2d   :  { %889 = vmatpush3.bf16.msra.mxu1 %v864_v61 }
  0x2e   :  { %890 = vmatprep.subr.bf16.mxu1 %v942_v44 }
  0x2f   :  { %868 = vmatpush3.bf16.msra.mxu0 %v867_v0 }
  0x30   :  { %869 = vmatprep.subr.bf16.mxu0 %v942_v44 }
  0x31   :  { %892 = vmatpush3.bf16.msra.mxu1 %v867_v0 }
  0x32   :  { %893 = vmatprep.subr.bf16.mxu1 %v942_v44 }
  0x33   :  { %871 = vmatpush3.bf16.msra.mxu0 %v870_v3 }
  0x34   :  { %872 = vmatprep.subr.bf16.mxu0 %v942_v44 }
  0x35   :  { %895 = vmatpush3.bf16.msra.mxu1 %v870_v3 }
  0x36   :  { %896 = vmatprep.subr.bf16.mxu1 %v942_v44 }
  0x37   :  { %874 = vmatpush3.bf16.msra.mxu0 %v873_v6 }
  0x38   :  { %875 = vmatprep.subr.bf16.mxu0 %v942_v44 }
  0x39   :  { %898 = vmatpush3.bf16.msra.mxu1 %v873_v6 }
  0x3a   :  { %899 = vmatprep.subr.bf16.mxu1 %v942_v44 }
  0x3b   :  { %877 = vmatpush3.bf16.msra.mxu0 %v876_v9 }
  0x3c   :  { %878 = vmatprep.subr.bf16.mxu0 %v942_v44 }
  0x3d   :  { %901 = vmatpush3.bf16.msra.mxu1 %v876_v9  ;;  %v602_v9 = vld [vmem:[%s1182_s3] sm:$0x1] }
  0x3e   :  { %902 = vmatprep.subr.bf16.mxu1 %v942_v44 }
  0x3f   :  { %880 = vmatpush3.bf16.msra.mxu0 %v879_v12 }
  0x41   :  { %904 = vmatpush3.bf16.msra.mxu1 %v879_v12 }
  0xf5   :  { %v711_v14 = vpop.f32.mrb[0].mxu0 }
  0xf6   :  { %v712_v15 = vpop.f32.mrb[1].mxu0 }
  0xf7   :  { %v713_v16 = vadd.f32 %v712_v15, %v711_v14  ;;  %v714_v17 = vpop.f32.mrb[2].mxu0  ;;  %v785_v18 = vpop.f32.mrb[0].mxu1 }
  0xf8   :  { %v715_v19 = vpop.f32.mrb[3].mxu0  ;;  %v404_v21 = vpop.f32.mrb[1].mxu1 }
  0xf9   :  { %v716_v20 = vadd.f32 %v715_v19, %v714_v17  ;;  %v1149_v22 = vadd.f32 %v713_v16, %v404_v21  ;;  %v786_v23 = vpop.f32.mrb[2].mxu1 }
  0xfa   :  { %v407_v24 = vpop.f32.mrb[3].mxu1 }
  0xfb   :  { %v1151_v25 = vadd.f32 %v716_v20, %v407_v24  ;;  %v428_v32 = vmul.f32 %v1149_v22, %v1149_v22 }
  0xfd   :  { %v717_v26 = vpop.f32.mrb[4].mxu0  ;;  %v429_v28 = vmul.f32 %v1151_v25, %v1151_v25  ;;  %v419_v33 = vadd.f32 %v1151_v25, %v1149_v22 }
  0xfe   :  { %v718_v27 = vpop.f32.mrb[5].mxu0 }
  0xff   :  { %v719_v29 = vadd.f32 %v718_v27, %v717_v26  ;;  %v720_v30 = vpop.f32.mrb[6].mxu0  ;;  %v432_v36 = vadd.f32 %v429_v28, %v428_v32 }
 0x100   :  { %v721_v31 = vpop.f32.mrb[7].mxu0 }
 0x101   :  { %v413_v34 = vadd.f32 %v785_v18, %v719_v29  ;;  %v722_v35 = vadd.f32 %v721_v31, %v720_v30 }
 0x103   :  { %v420_v37 = vadd.f32 %v419_v33, %v413_v34  ;;  %v430_v38 = vmul.f32 %v413_v34, %v413_v34  ;;  %v416_v39 = vadd.f32 %v786_v23, %v722_v35 }
 0x105   :  { %v433_v40 = vadd.f32 %v432_v36, %v430_v38  ;;  %v421_v41 = vadd.f32 %v420_v37, %v416_v39  ;;  %v431_v42 = vmul.f32 %v416_v39, %v416_v39 }
 0x107   :  { %v422_v43 = vrot.slane %v421_v41, 4  ;;  %v434_v44 = vadd.f32 %v433_v40, %v431_v42 }
 0x109   :  { %v423_v45 = vadd.f32 %v422_v43, %v421_v41  ;;  %v435_v46 = vrot.slane %v434_v44, 4 }
 0x10b   :  { %v424_v47 = vrot.slane %v423_v45, 2  ;;  %v436_v48 = vadd.f32 %v435_v46, %v434_v44 }
 0x10d   :  { %v425_v49 = vadd.f32 %v424_v47, %v423_v45  ;;  %v437_v50 = vrot.slane %v436_v48, 2 }
 0x10f   :  { %v426_v51 = vrot.slane %v425_v49, 1  ;;  %v438_v52 = vadd.f32 %v437_v50, %v436_v48 }
 0x111   :  { %v427_v53 = vadd.f32 %v426_v51, %v425_v49  ;;  %v439_v54 = vrot.slane %v438_v52, 1 }
 0x113   :  { %820 = vmatmul.mubr.f32.vlgmr.msra.gmra.mrb[8].mxu0 %v427_v53  ;;  %v440_v55 = vadd.f32 %v439_v54, %v438_v52 }
 0x115   :  { %855 = vmatmul.mubr.f32.vlgmr.msra.gmra.mrb[4].mxu1 %v440_v55 }
 0x1e6   :  { %v523_v56 = vpop.f32.mrb[8].mxu0 }
 0x1e7   :  { %v597_v57 = vmul.f32 0.001953125, %v523_v56  ;;  %v821_v58 = vpop.f32.mrb[9].mxu0 }
 0x1e8   :  { %v593_v59 = vpop.f32.mrb[4].mxu1 }
 0x1e9   :  { %v599_v60 = vmul.f32 %v597_v57, %v597_v57  ;;  %v598_v61 = vmul.f32 0.001953125, %v593_v59  ;;  %v856_v62 = vpop.f32.mrb[5].mxu1 }
 0x1eb   :  { %v600_v63 = vsub.f32 %v598_v61, %v599_v60 }
 0x1ed   :  { %v601_v0 = vmax.f32 %v600_v63, 0.0 }
 0x1ef   :  { %v603_v1 = vadd.f32 1e-05, %v601_v0 }
 0x1f1   :  { %938 = vrsqrt.f32 %v603_v1  ;;  %vm606_vm6 = vcmp.eq.f32.partialorder %v603_v1, inf  ;;  %v609_v4 = vand.u32 2147483648, %v603_v1  ;;  %vm608_vm7 = vcmp.eq.f32.partialorder %v603_v1, 0.0 }
 0x1fb   :  { %v939_v2 = vpop.eup %938 }
 0x1fc   :  { %v605_v3 = vmul.f32 %v939_v2, %v603_v1 }
 0x1fe   :  { %v607_v5 = vsel %vm606_vm6, %v603_v1, %v605_v3 }
 0x1ff   :  { %v610_v6 = vsel %vm608_vm7, %v609_v4, %v607_v5 }
 0x200   :  { %940 = vrcp.f32 %v610_v6 }
 0x20a   :  { %v941_v11 = vpop.eup %940 }
 0x20b   :  { %v612_v12 = vmul.f32 %v941_v11, %v602_v9 }
 0x20d   :  { %v614_v14 = vmul.f32 %v612_v12, %v597_v57  ;;  %v620_v15 = vrot.slane %v612_v12, %v619_v10 }
 0x20f   :  { %v615_v16 = vsub.f32 %v613_v13, %v614_v14  ;;  %v622_v17 = vmul.f32 %v620_v15, %v1149_v22  ;;  %v623_v18 = vmul.f32 %v620_v15, %v1151_v25  ;;  %v624_v19 = vmul.f32 %v620_v15, %v413_v34 }
 0x210   :  { %v625_v20 = vmul.f32 %v620_v15, %v416_v39 }
 0x211   :  { %v630_v21 = vrot.slane %v615_v16, %v619_v10 }
 0x213   :  { %v632_v23 = vadd.f32 %v630_v21, %v622_v17  ;;  %v633_v24 = vadd.f32 %v630_v21, %v623_v18  ;;  %v634_v26 = vadd.f32 %v630_v21, %v624_v19  ;;  %v635_v27 = vadd.f32 %v630_v21, %v625_v20 }
 0x215   :  { %vm636_vm8 = vcmp.ge.f32.partialorder %v632_v23, 0.0  ;;  %vm637_vm9 = vcmp.ge.f32.partialorder %v633_v24, 0.0  ;;  %vm638_vm10 = vcmp.ge.f32.partialorder %v634_v26, 0.0  ;;  %vm639_vm11 = vcmp.ge.f32.partialorder %v635_v27, 0.0 }
 0x216   :  { %v640_v28 = vmul.f32 0.1, %v632_v23  ;;  %v641_v29 = vmul.f32 0.1, %v633_v24  ;;  %v642_v30 = vmul.f32 0.1, %v634_v26 }
 0x217   :  { %v643_v31 = vmul.f32 0.1, %v635_v27 }
 0x218   :  { %v644_v32 = vsel %vm636_vm8, %v632_v23, %v640_v28  ;;  %v645_v33 = vsel %vm637_vm9, %v633_v24, %v641_v29  ;;  %v646_v22 = vsel %vm638_vm10, %v634_v26, %v642_v30 }
 0x219   :  { %v647_v35 = vsel %vm639_vm11, %v635_v27, %v643_v31  ;;  %648 = vst [vmem:[%s1184_s5] sm:$0xff] %v644_v32  ;;  %649 = vst [vmem:[%s1184_s5 + $0x8] sm:$0xff] %v645_v33 }
 0x21a   :  { %693 = vst [vmem:[%s1184_s5 + $0x10] sm:$0xff] %v646_v22  ;;  %694 = vst [vmem:[%s1184_s5 + $0x18] sm:$0xff] %v647_v35 }

</bundles_post_ra>
